<compile_context>
chip_gen: v6e
topology: v6e:2x2x1
jax: 0.10.0
libtpu: 0.0.40
codegen_flags: <defaults>
</compile_context>

<pallas_src>
import math
import functools
import numpy as np
import jax
import jax.numpy as jnp
from jax.experimental import pallas as pl
from jax.experimental.pallas import tpu as pltpu

# ----- small config (stand-in for bert-base-uncased / opt.embed_size) -----
B = 2            # batch
L = 8            # sequence length
V = 30           # vocab size (0 == PAD)
H = 32           # BERT hidden size (stands in for 768)
NH = 2           # attention heads
DH = H // NH
FFN = 64         # BERT intermediate size
NLAYERS = 2
E = 32           # opt.embed_size
PE = 32          # GPO d_pe
HG = 32          # GPO d_hidden
MAXPOS = 16

F32 = jnp.float32
VMEM_SPEC = pl.BlockSpec(memory_space=pltpu.MemorySpace.VMEM)


def _layernorm(x, g, b, eps):
    mu = jnp.mean(x, axis=-1, keepdims=True)
    var = jnp.mean(jnp.square(x - mu), axis=-1, keepdims=True)
    return (x - mu) * jax.lax.rsqrt(var + eps) * g + b


# ------------- fused BERT encoder + fc / MLP feature branches ---------------

def _encoder_kernel(x_ref, mask_ref, embg_ref, embb_ref,
                    wqkv_ref, bqkv_ref, wo_ref, bo_ref,
                    ln1g_ref, ln1b_ref, wi_ref, bi_ref,
                    wo2_ref, bo2_ref, ln2g_ref, ln2b_ref,
                    wbr_ref, bbr_ref, w2_ref, b2_ref,
                    o_ref, *, bn, sl):
    scale = 1.0 / math.sqrt(DH)
    x = _layernorm(x_ref[...], embg_ref[...], embb_ref[...], 1e-12)       # (bn*sl, H)

    # additive attention bias derived in-kernel from the (bn, sl) mask and
    # hoisted out of the layer loop (no HBM-resident (B*NH, L, L) broadcast).
    bias3 = jnp.broadcast_to(((mask_ref[...] - 1.0) * 10000.0)[:, None, :],
                             (bn, sl, sl))                                # (bn, sl, sl)

    for layer in range(NLAYERS):
        # fused QKV: one (H, 3H) matmul instead of three narrow ones
        qkv = jnp.dot(x, wqkv_ref[layer],
                      preferred_element_type=jnp.float32) + bqkv_ref[layer]   # (bn*sl, 3H)
        head_outs = []
        for h in range(NH):
            q = qkv[:, h * DH:(h + 1) * DH].reshape(bn, sl, DH)
            k = qkv[:, H + h * DH:H + (h + 1) * DH].reshape(bn, sl, DH)
            v = qkv[:, 2 * H + h * DH:2 * H + (h + 1) * DH].reshape(bn, sl, DH)
            s = jnp.einsum("bqd,bkd->bqk", q, k,
                           preferred_element_type=jnp.float32) * scale + bias3
            s = s - jnp.max(s, axis=-1, keepdims=True)
            p = jnp.exp(s)
            p = p / jnp.sum(p, axis=-1, keepdims=True)
            ctx = jnp.einsum("bqk,bkd->bqd", p, v,
                             preferred_element_type=jnp.float32)
            head_outs.append(ctx.reshape(bn * sl, DH))
        ctx = jnp.concatenate(head_outs, axis=1)                          # (bn*sl, H)
        attn_out = jnp.dot(ctx, wo_ref[layer],
                           preferred_element_type=jnp.float32) + bo_ref[layer]
        x = _layernorm(attn_out + x, ln1g_ref[layer], ln1b_ref[layer], 1e-12)
        hmid = jax.nn.gelu(
            jnp.dot(x, wi_ref[layer], preferred_element_type=jnp.float32)
            + bi_ref[layer], approximate=True)
        ffn_out = jnp.dot(hmid, wo2_ref[layer],
                          preferred_element_type=jnp.float32) + bo2_ref[layer]
        x = _layernorm(ffn_out + x, ln2g_ref[layer], ln2b_ref[layer], 1e-12)

    # fused feature branches: [fc | folded-BN MLP layer-1] in one matmul,
    # ReLU + second MLP matmul + branch add as the epilogue.
    ybr = jnp.dot(x, wbr_ref[...], preferred_element_type=jnp.float32) + bbr_ref[...]
    cap_emb = ybr[:, :E]
    hmlp = jnp.maximum(ybr[:, E:], 0.0)
    mlp_out = jnp.dot(hmlp, w2_ref[...],
                      preferred_element_type=jnp.float32) + b2_ref[...]
    o_ref[...] = mlp_out + cap_emb                                        # (bn*sl, E)


# -------- fused GPO head: bi-GRU + score softmax + pooling + LayerNorm ------

def _gpo_pool_kernel(pes_ref, mask_ref, mask_tb_ref, sortf_ref,
                     wih_ref, bih_ref, whhf_ref, bhhf_ref,
                     whhb_ref, bhhb_ref, wlin_ref, lng_ref, lnb_ref,
                     o_ref, *, bn, seq_len):
    T = seq_len
    m = mask_ref[...]                                                     # (bn, T)
    # input-side gate projections for every timestep and both directions in
    # ONE lane-dense (T*bn, PE) @ (PE, 6*HG) matmul; only h @ Whh is serial.
    gin = jnp.dot(pes_ref[...], wih_ref[...],
                  preferred_element_type=jnp.float32) + bih_ref[...]      # (T*bn, 6HG)
    gin = gin.reshape(T, bn, 6 * HG)

    whh_f = whhf_ref[...]; bhh_f = bhhf_ref[...]
    whh_b = whhb_ref[...]; bhh_b = bhhb_ref[...]

    def cell(g, h, whh, bhh):
        # torch.nn.GRU gate order: r, z, n (gates stacked along the lane dim)
        hh = jnp.dot(h, whh, preferred_element_type=jnp.float32) + bhh    # (bn, 3HG)
        r = jax.nn.sigmoid(g[:, :HG] + hh[:, :HG])
        z = jax.nn.sigmoid(g[:, HG:2 * HG] + hh[:, HG:2 * HG])
        n = jnp.tanh(g[:, 2 * HG:] + r * hh[:, 2 * HG:])
        return (1.0 - z) * n + z * h

    # pack_padded semantics for trailing padding: zero the hidden state at
    # padded steps so padded outputs are 0 and the backward pass starts at the
    # last valid token with h = 0.
    h_f = jnp.zeros((bn, HG), jnp.float32)
    h_b = jnp.zeros((bn, HG), jnp.float32)
    fw = [None] * T
    bw = [None] * T
    for t in range(T):
        h_f = m[:, t:t + 1] * cell(gin[t][:, :3 * HG], h_f, whh_f, bhh_f)
        fw[t] = h_f
    for t in range(T - 1, -1, -1):
        h_b = m[:, t:t + 1] * cell(gin[t][:, 3 * HG:], h_b, whh_b, bhh_b)
        bw[t] = h_b

    # stack GRU outputs time-major and score them with a single lane reduction
    # (instead of T separate reductions + concat).
    emb = jnp.concatenate([(fw[t] + bw[t])[None, :, :] for t in range(T)],
                          axis=0) * 0.5                                   # (T, bn, HG)
    scores = jnp.sum(emb * wlin_ref[...][None, :, :], axis=-1,
                     keepdims=True)                                       # (T, bn, 1)
    scores = jnp.where(mask_tb_ref[...] > 0, scores, -10000.0) / 0.1
    scores = scores - jnp.max(scores, axis=0, keepdims=True)
    ex = jnp.exp(scores)
    w = ex / jnp.sum(ex, axis=0, keepdims=True)                           # (T, bn, 1)

    # weighted pooling over the (time-major) sorted features + final LayerNorm
    pooled = jnp.sum(sortf_ref[...] * w, axis=0)                          # (bn, E)
    o_ref[...] = _layernorm(pooled, lng_ref[...], lnb_ref[...], 1e-5)


# --------------------------- parameter init -------------------------------

def positional_encoding_1d(d_model, length):
    pe = np.zeros((length, d_model), dtype=np.float32)
    position = np.arange(0, length, dtype=np.float32)[:, None]
    div_term = np.exp(np.arange(0, d_model, 2, dtype=np.float32)
                      * -(math.log(10000.0) / d_model))
    pe[:, 0::2] = np.sin(position * div_term)
    pe[:, 1::2] = np.cos(position * div_term)
    return jnp.asarray(pe)


def init_params(key):
    ks = iter(jax.random.split(key, 192))

    def nrm(shape, scale=0.02):
        return scale * jax.random.normal(next(ks), shape, F32)

    p = {}
    # BERT embeddings
    p["word_emb"] = nrm((V, H))
    p["pos_emb"] = nrm((MAXPOS, H))
    p["type_emb"] = nrm((2, H))
    p["emb_ln_g"] = jnp.ones((1, H), F32) + nrm((1, H), 0.1)
    p["emb_ln_b"] = nrm((1, H), 0.1)
    # BERT encoder layers
    layers = []
    for _ in range(NLAYERS):
        layers.append(dict(
            wq=nrm((H, H)), bq=nrm((1, H)),
            wk=nrm((H, H)), bk=nrm((1, H)),
            wv=nrm((H, H)), bv=nrm((1, H)),
            wo=nrm((H, H)), bo=nrm((1, H)),
            ln1_g=jnp.ones((1, H), F32) + nrm((1, H), 0.1), ln1_b=nrm((1, H), 0.1),
            wi=nrm((H, FFN)), bi=nrm((1, FFN)),
            wo2=nrm((FFN, H)), bo2=nrm((1, H)),
            ln2_g=jnp.ones((1, H), F32) + nrm((1, H), 0.1), ln2_b=nrm((1, H), 0.1),
        ))
    p["layers"] = layers
    # fc
    p["fc_w"] = nrm((H, E))
    p["fc_b"] = nrm((1, E))
    # MLP(768 -> E//2 -> E) with BatchNorm1d on the hidden layer (eval mode)
    p["mlp_w1"] = nrm((H, E // 2))
    p["mlp_b1"] = nrm((1, E // 2))
    p["bn_g"] = jnp.ones((E // 2,), F32) + 0.1 * jax.random.normal(next(ks), (E // 2,), F32)
    p["bn_b"] = 0.1 * jax.random.normal(next(ks), (E // 2,), F32)
    p["bn_rm"] = jnp.zeros((E // 2,), F32)
    p["bn_rv"] = jnp.ones((E // 2,), F32)
    p["mlp_w2"] = nrm((E // 2, E))
    p["mlp_b2"] = nrm((1, E))
    # final LayerNorm
    p["ln_g"] = jnp.ones((1, E), F32) + nrm((1, E), 0.1)
    p["ln_b"] = nrm((1, E), 0.1)
    # GPO bi-GRU (stacked gates: r, z, n) + scoring linear (no bias)
    for d in ("f", "b"):
        p[f"gru_wih_{d}"] = nrm((3, PE, HG))
        p[f"gru_whh_{d}"] = nrm((3, HG, HG))
        p[f"gru_bih_{d}"] = nrm((3, 1, HG))
        p[f"gru_bhh_{d}"] = nrm((3, 1, HG))
    p["gpo_lin"] = nrm((1, HG))
    return p


# ------------------------------ forward -----------------------------------

def encoder_text_forward(params, ids, lengths_np):
    bn, sl = ids.shape
    attn_mask = (ids != 0).astype(F32)                                   # (B, L)

    # --- BERT embeddings (gather in glue; LayerNorm fused into the kernel) ---
    x3 = (jnp.take(params["word_emb"], ids, axis=0)
          + params["pos_emb"][None, :sl, :]
          + params["type_emb"][0][None, None, :])                        # (B, L, H)
    x_emb = x3.reshape(bn * sl, H)

    # --- pack per-layer weights: stacked over layers, QKV fused to (H, 3H) ---
    Ls = params["layers"]
    wqkv = jnp.stack([jnp.concatenate([lp["wq"], lp["wk"], lp["wv"]], axis=1) for lp in Ls])
    bqkv = jnp.stack([jnp.concatenate([lp["bq"], lp["bk"], lp["bv"]], axis=1) for lp in Ls])
    wo = jnp.stack([lp["wo"] for lp in Ls])
    bo = jnp.stack([lp["bo"] for lp in Ls])
    ln1g = jnp.stack([lp["ln1_g"] for lp in Ls])
    ln1b = jnp.stack([lp["ln1_b"] for lp in Ls])
    wi = jnp.stack([lp["wi"] for lp in Ls])
    bi = jnp.stack([lp["bi"] for lp in Ls])
    wo2 = jnp.stack([lp["wo2"] for lp in Ls])
    bo2 = jnp.stack([lp["bo2"] for lp in Ls])
    ln2g = jnp.stack([lp["ln2_g"] for lp in Ls])
    ln2b = jnp.stack([lp["ln2_b"] for lp in Ls])

    # --- fold BatchNorm1d (eval mode) into MLP layer 1 and fuse with fc ---
    s = params["bn_g"] / jnp.sqrt(params["bn_rv"] + 1e-5)
    w1f = params["mlp_w1"] * s[None, :]
    b1f = (params["mlp_b1"] - params["bn_rm"][None, :]) * s[None, :] + params["bn_b"][None, :]
    wbr = jnp.concatenate([params["fc_w"], w1f], axis=1)                 # (H, E + E//2)
    bbr = jnp.concatenate([params["fc_b"], b1f], axis=1)                 # (1, E + E//2)

    feat_flat = pl.pallas_call(
        functools.partial(_encoder_kernel, bn=bn, sl=sl),
        out_shape=jax.ShapeDtypeStruct((bn * sl, E), F32),
        in_specs=[VMEM_SPEC] * 20,
        out_specs=VMEM_SPEC,
    )(x_emb, attn_mask, params["emb_ln_g"], params["emb_ln_b"],
      wqkv, bqkv, wo, bo, ln1g, ln1b, wi, bi, wo2, bo2, ln2g, ln2b,
      wbr, bbr, params["mlp_w2"], params["mlp_b2"])
    features = feat_flat.reshape(bn, sl, E)                              # (B, L, E)
    # TODO(synk): nn.Dropout(0.2) is identity at inference; omitted.

    # --- GPO pooling ---
    max_len = int(lengths_np.max())
    lengths = jnp.asarray(lengths_np, jnp.int32)
    mask = (jnp.arange(max_len)[None, :] < lengths[:, None]).astype(F32)  # (B, T)
    mask_tb = jnp.transpose(mask)[:, :, None]                             # (T, B, 1)
    pe = positional_encoding_1d(PE, max_len)                              # (T, PE)
    # masked positional encodings, time-major and flattened for the fused
    # (T*B, PE) @ (PE, 6*HG) GRU input projection.
    pes_flat = (pe[:, None, :] * jnp.transpose(mask)[:, :, None]).reshape(max_len * bn, PE)

    # descending sort of masked features along the sequence dim (XLA glue;
    # no clean Pallas equivalent for sort), handed to the kernel time-major.
    feats_t = features[:, :max_len, :]
    valid = mask[:, :, None] > 0
    sorted_f = jnp.where(valid, feats_t, -10000.0)
    sorted_f = -jnp.sort(-sorted_f, axis=1)
    sorted_f = jnp.where(valid, sorted_f, 0.0)
    sorted_tb = jnp.transpose(sorted_f, (1, 0, 2))                        # (T, B, E)

    # --- pack bi-GRU gate weights: [r|z|n] per direction, forward||backward ---
    def pack(w3):        # (3, A, C) -> (A, 3C)
        return jnp.concatenate([w3[0], w3[1], w3[2]], axis=1)
    wih_all = jnp.concatenate([pack(params["gru_wih_f"]), pack(params["gru_wih_b"])], axis=1)
    bih_all = jnp.concatenate([pack(params["gru_bih_f"]), pack(params["gru_bih_b"])], axis=1)
    whh_f, bhh_f = pack(params["gru_whh_f"]), pack(params["gru_bhh_f"])
    whh_b, bhh_b = pack(params["gru_whh_b"]), pack(params["gru_bhh_b"])

    pooled = pl.pallas_call(
        functools.partial(_gpo_pool_kernel, bn=bn, seq_len=max_len),
        out_shape=jax.ShapeDtypeStruct((bn, E), F32),
        in_specs=[VMEM_SPEC] * 13,
        out_specs=VMEM_SPEC,
    )(pes_flat, mask, mask_tb, sorted_tb,
      wih_all, bih_all, whh_f, bhh_f, whh_b, bhh_b,
      params["gpo_lin"], params["ln_g"], params["ln_b"])

    return pooled, features


# ------------------------------- main --------------------------------------

if __name__ == "__main__":
    key = jax.random.PRNGKey(0)
    pkey, ikey = jax.random.split(key)
    params = init_params(pkey)

    lengths_np = np.array([L, 5], dtype=np.int32)
    ids = jax.random.randint(ikey, (B, L), 1, V, dtype=jnp.int32)
    ids = jnp.where(jnp.arange(L)[None, :] < jnp.asarray(lengths_np)[:, None], ids, 0)

    pooled, features = encoder_text_forward(params, ids, lengths_np)
    jax.block_until_ready((pooled, features))
    assert pooled.shape == (B, E) and features.shape == (B, L, E)
    assert bool(jnp.all(jnp.isfinite(pooled))) and bool(jnp.all(jnp.isfinite(features)))
    print("KERNEL_OK")
</pallas_src>

<mosaic_0001>
module attributes {stable_mosaic.version = 11 : i64} {
  func.func @_encoder_kernel(%arg0: memref<16x32xf32, #tpu.memory_space<vmem>>, %arg1: memref<2x8xf32, #tpu.memory_space<vmem>>, %arg2: memref<1x32xf32, #tpu.memory_space<vmem>>, %arg3: memref<1x32xf32, #tpu.memory_space<vmem>>, %arg4: memref<2x32x96xf32, #tpu.memory_space<vmem>>, %arg5: memref<2x1x96xf32, #tpu.memory_space<vmem>>, %arg6: memref<2x32x32xf32, #tpu.memory_space<vmem>>, %arg7: memref<2x1x32xf32, #tpu.memory_space<vmem>>, %arg8: memref<2x1x32xf32, #tpu.memory_space<vmem>>, %arg9: memref<2x1x32xf32, #tpu.memory_space<vmem>>, %arg10: memref<2x32x64xf32, #tpu.memory_space<vmem>>, %arg11: memref<2x1x64xf32, #tpu.memory_space<vmem>>, %arg12: memref<2x64x32xf32, #tpu.memory_space<vmem>>, %arg13: memref<2x1x32xf32, #tpu.memory_space<vmem>>, %arg14: memref<2x1x32xf32, #tpu.memory_space<vmem>>, %arg15: memref<2x1x32xf32, #tpu.memory_space<vmem>>, %arg16: memref<32x48xf32, #tpu.memory_space<vmem>>, %arg17: memref<1x48xf32, #tpu.memory_space<vmem>>, %arg18: memref<16x32xf32, #tpu.memory_space<vmem>>, %arg19: memref<1x32xf32, #tpu.memory_space<vmem>>, %arg20: memref<16x32xf32, #tpu.memory_space<vmem>>) attributes {dimension_semantics = [], scalar_prefetch = 0 : i64, scratch_operands = 0 : i64, tpu.core_type = #tpu.core_type<tc>} {
    %c0 = arith.constant 0 : index
    %c0_0 = arith.constant 0 : index
    %0 = vector.load %arg0[%c0, %c0_0] : memref<16x32xf32, #tpu.memory_space<vmem>>, vector<16x32xf32>
    %c0_1 = arith.constant 0 : index
    %c0_2 = arith.constant 0 : index
    %1 = vector.load %arg2[%c0_1, %c0_2] : memref<1x32xf32, #tpu.memory_space<vmem>>, vector<1x32xf32>
    %c0_3 = arith.constant 0 : index
    %c0_4 = arith.constant 0 : index
    %2 = vector.load %arg3[%c0_3, %c0_4] : memref<1x32xf32, #tpu.memory_space<vmem>>, vector<1x32xf32>
    %cst = arith.constant dense<0.000000e+00> : vector<16xf32>
    %3 = vector.multi_reduction <add>, %0, %cst [1] : vector<16x32xf32> to vector<16xf32>
    %4 = vector.shape_cast %3 : vector<16xf32> to vector<16x1xf32>
    %cst_5 = arith.constant 3.200000e+01 : f32
    %5 = vector.broadcast %cst_5 : f32 to vector<16x1xf32>
    %6 = arith.divf %4, %5 : vector<16x1xf32>
    %7 = vector.broadcast %6 : vector<16x1xf32> to vector<16x32xf32>
    %8 = arith.subf %0, %7 : vector<16x32xf32>
    %9 = arith.mulf %8, %8 : vector<16x32xf32>
    %cst_6 = arith.constant dense<0.000000e+00> : vector<16xf32>
    %10 = vector.multi_reduction <add>, %9, %cst_6 [1] : vector<16x32xf32> to vector<16xf32>
    %11 = vector.shape_cast %10 : vector<16xf32> to vector<16x1xf32>
    %cst_7 = arith.constant 3.200000e+01 : f32
    %12 = vector.broadcast %cst_7 : f32 to vector<16x1xf32>
    %13 = arith.divf %11, %12 : vector<16x1xf32>
    %14 = vector.broadcast %6 : vector<16x1xf32> to vector<16x32xf32>
    %15 = arith.subf %0, %14 : vector<16x32xf32>
    %cst_8 = arith.constant 9.99999996E-13 : f32
    %16 = vector.broadcast %cst_8 : f32 to vector<16x1xf32>
    %17 = arith.addf %13, %16 : vector<16x1xf32>
    %18 = math.rsqrt %17 : vector<16x1xf32>
    %19 = vector.broadcast %18 : vector<16x1xf32> to vector<16x32xf32>
    %20 = arith.mulf %15, %19 : vector<16x32xf32>
    %21 = vector.broadcast %1 : vector<1x32xf32> to vector<16x32xf32>
    %22 = arith.mulf %20, %21 : vector<16x32xf32>
    %23 = vector.broadcast %2 : vector<1x32xf32> to vector<16x32xf32>
    %24 = arith.addf %22, %23 : vector<16x32xf32>
    %c0_9 = arith.constant 0 : index
    %c0_10 = arith.constant 0 : index
    %25 = vector.load %arg1[%c0_9, %c0_10] : memref<2x8xf32, #tpu.memory_space<vmem>>, vector<2x8xf32>
    %cst_11 = arith.constant 1.000000e+00 : f32
    %26 = vector.broadcast %cst_11 : f32 to vector<2x8xf32>
    %27 = arith.subf %25, %26 : vector<2x8xf32>
    %cst_12 = arith.constant 1.000000e+04 : f32
    %28 = vector.broadcast %cst_12 : f32 to vector<2x8xf32>
    %29 = arith.mulf %27, %28 : vector<2x8xf32>
    %30 = vector.shape_cast %29 : vector<2x8xf32> to vector<2x1x8xf32>
    %31 = vector.shape_cast %30 : vector<2x1x8xf32> to vector<2x1x8xf32>
    %32 = vector.broadcast %31 : vector<2x1x8xf32> to vector<2x8x8xf32>
    %c0_13 = arith.constant 0 : index
    %c0_14 = arith.constant 0 : index
    %c0_15 = arith.constant 0 : index
    %33 = vector.load %arg4[%c0_13, %c0_14, %c0_15] : memref<2x32x96xf32, #tpu.memory_space<vmem>>, vector<1x32x96xf32>
    %34 = vector.shape_cast %33 : vector<1x32x96xf32> to vector<32x96xf32>
    %cst_16 = arith.constant dense<0.000000e+00> : vector<16x96xf32>
    %35 = tpu.matmul %24, %34, %cst_16 {dimension_numbers = #tpu.dot_dimension_numbers<[1], [0], [0], [1], [0, 0, 1, 1], [], []>} : vector<16x32xf32>, vector<32x96xf32>, vector<16x96xf32> -> vector<16x96xf32>
    %c0_17 = arith.constant 0 : index
    %c0_18 = arith.constant 0 : index
    %c0_19 = arith.constant 0 : index
    %36 = vector.load %arg5[%c0_17, %c0_18, %c0_19] : memref<2x1x96xf32, #tpu.memory_space<vmem>>, vector<1x1x96xf32>
    %37 = vector.shape_cast %36 : vector<1x1x96xf32> to vector<1x96xf32>
    %38 = vector.broadcast %37 : vector<1x96xf32> to vector<16x96xf32>
    %39 = arith.addf %35, %38 : vector<16x96xf32>
    %40 = vector.extract_strided_slice %39 {offsets = [0, 0], sizes = [16, 16], strides = [1, 1]} : vector<16x96xf32> to vector<16x16xf32>
    %41 = vector.shape_cast %40 : vector<16x16xf32> to vector<2x8x16xf32>
    %42 = vector.extract_strided_slice %39 {offsets = [0, 32], sizes = [16, 16], strides = [1, 1]} : vector<16x96xf32> to vector<16x16xf32>
    %43 = vector.shape_cast %42 : vector<16x16xf32> to vector<2x8x16xf32>
    %44 = vector.extract_strided_slice %39 {offsets = [0, 64], sizes = [16, 16], strides = [1, 1]} : vector<16x96xf32> to vector<16x16xf32>
    %45 = vector.shape_cast %44 : vector<16x16xf32> to vector<2x8x16xf32>
    "tpu.trace_start"() <{level = 10 : i32, message = "bqd,bkd->bqk"}> : () -> ()
    %cst_20 = arith.constant dense<0.000000e+00> : vector<2x8x8xf32>
    %46 = tpu.matmul %41, %43, %cst_20 {dimension_numbers = #tpu.dot_dimension_numbers<[2], [2], [1], [1], [0, 0, 0, 1, 1, 1], [0], [0]>} : vector<2x8x16xf32>, vector<2x8x16xf32>, vector<2x8x8xf32> -> vector<2x8x8xf32>
    "tpu.trace_stop"() : () -> ()
    %cst_21 = arith.constant 2.500000e-01 : f32
    %47 = vector.broadcast %cst_21 : f32 to vector<2x8x8xf32>
    %48 = arith.mulf %46, %47 : vector<2x8x8xf32>
    %49 = arith.addf %48, %32 : vector<2x8x8xf32>
    %cst_22 = arith.constant dense<0xFF800000> : vector<2x8xf32>
    %50 = vector.multi_reduction <maximumf>, %49, %cst_22 [2] : vector<2x8x8xf32> to vector<2x8xf32>
    %51 = vector.shape_cast %50 : vector<2x8xf32> to vector<2x8x1xf32>
    %52 = vector.broadcast %51 : vector<2x8x1xf32> to vector<2x8x8xf32>
    %53 = arith.subf %49, %52 : vector<2x8x8xf32>
    %54 = math.exp %53 : vector<2x8x8xf32>
    %cst_23 = arith.constant dense<0.000000e+00> : vector<2x8xf32>
    %55 = vector.multi_reduction <add>, %54, %cst_23 [2] : vector<2x8x8xf32> to vector<2x8xf32>
    %56 = vector.shape_cast %55 : vector<2x8xf32> to vector<2x8x1xf32>
    %57 = vector.broadcast %56 : vector<2x8x1xf32> to vector<2x8x8xf32>
    %58 = arith.divf %54, %57 : vector<2x8x8xf32>
    "tpu.trace_start"() <{level = 10 : i32, message = "bqk,bkd->bqd"}> : () -> ()
    %cst_24 = arith.constant dense<0.000000e+00> : vector<2x8x16xf32>
    %59 = tpu.matmul %58, %45, %cst_24 {dimension_numbers = #tpu.dot_dimension_numbers<[2], [1], [1], [2], [0, 0, 0, 1, 1, 2], [0], [0]>} : vector<2x8x8xf32>, vector<2x8x16xf32>, vector<2x8x16xf32> -> vector<2x8x16xf32>
    "tpu.trace_stop"() : () -> ()
    %60 = vector.shape_cast %59 : vector<2x8x16xf32> to vector<16x16xf32>
    %61 = vector.extract_strided_slice %39 {offsets = [0, 16], sizes = [16, 16], strides = [1, 1]} : vector<16x96xf32> to vector<16x16xf32>
    %62 = vector.shape_cast %61 : vector<16x16xf32> to vector<2x8x16xf32>
    %63 = vector.extract_strided_slice %39 {offsets = [0, 48], sizes = [16, 16], strides = [1, 1]} : vector<16x96xf32> to vector<16x16xf32>
    %64 = vector.shape_cast %63 : vector<16x16xf32> to vector<2x8x16xf32>
    %65 = vector.extract_strided_slice %39 {offsets = [0, 80], sizes = [16, 16], strides = [1, 1]} : vector<16x96xf32> to vector<16x16xf32>
    %66 = vector.shape_cast %65 : vector<16x16xf32> to vector<2x8x16xf32>
    "tpu.trace_start"() <{level = 10 : i32, message = "bqd,bkd->bqk"}> : () -> ()
    %cst_25 = arith.constant dense<0.000000e+00> : vector<2x8x8xf32>
    %67 = tpu.matmul %62, %64, %cst_25 {dimension_numbers = #tpu.dot_dimension_numbers<[2], [2], [1], [1], [0, 0, 0, 1, 1, 1], [0], [0]>} : vector<2x8x16xf32>, vector<2x8x16xf32>, vector<2x8x8xf32> -> vector<2x8x8xf32>
    "tpu.trace_stop"() : () -> ()
    %cst_26 = arith.constant 2.500000e-01 : f32
    %68 = vector.broadcast %cst_26 : f32 to vector<2x8x8xf32>
    %69 = arith.mulf %67, %68 : vector<2x8x8xf32>
    %70 = arith.addf %69, %32 : vector<2x8x8xf32>
    %cst_27 = arith.constant dense<0xFF800000> : vector<2x8xf32>
    %71 = vector.multi_reduction <maximumf>, %70, %cst_27 [2] : vector<2x8x8xf32> to vector<2x8xf32>
    %72 = vector.shape_cast %71 : vector<2x8xf32> to vector<2x8x1xf32>
    %73 = vector.broadcast %72 : vector<2x8x1xf32> to vector<2x8x8xf32>
    %74 = arith.subf %70, %73 : vector<2x8x8xf32>
    %75 = math.exp %74 : vector<2x8x8xf32>
    %cst_28 = arith.constant dense<0.000000e+00> : vector<2x8xf32>
    %76 = vector.multi_reduction <add>, %75, %cst_28 [2] : vector<2x8x8xf32> to vector<2x8xf32>
    %77 = vector.shape_cast %76 : vector<2x8xf32> to vector<2x8x1xf32>
    %78 = vector.broadcast %77 : vector<2x8x1xf32> to vector<2x8x8xf32>
    %79 = arith.divf %75, %78 : vector<2x8x8xf32>
    "tpu.trace_start"() <{level = 10 : i32, message = "bqk,bkd->bqd"}> : () -> ()
    %cst_29 = arith.constant dense<0.000000e+00> : vector<2x8x16xf32>
    %80 = tpu.matmul %79, %66, %cst_29 {dimension_numbers = #tpu.dot_dimension_numbers<[2], [1], [1], [2], [0, 0, 0, 1, 1, 2], [0], [0]>} : vector<2x8x8xf32>, vector<2x8x16xf32>, vector<2x8x16xf32> -> vector<2x8x16xf32>
    "tpu.trace_stop"() : () -> ()
    %81 = vector.shape_cast %80 : vector<2x8x16xf32> to vector<16x16xf32>
    %82 = tpu.concatenate %60, %81 in 1 : vector<16x16xf32>, vector<16x16xf32> -> vector<16x32xf32>
    %c0_30 = arith.constant 0 : index
    %c0_31 = arith.constant 0 : index
    %c0_32 = arith.constant 0 : index
    %83 = vector.load %arg6[%c0_30, %c0_31, %c0_32] : memref<2x32x32xf32, #tpu.memory_space<vmem>>, vector<1x32x32xf32>
    %84 = vector.shape_cast %83 : vector<1x32x32xf32> to vector<32x32xf32>
    %cst_33 = arith.constant dense<0.000000e+00> : vector<16x32xf32>
    %85 = tpu.matmul %82, %84, %cst_33 {dimension_numbers = #tpu.dot_dimension_numbers<[1], [0], [0], [1], [0, 0, 1, 1], [], []>} : vector<16x32xf32>, vector<32x32xf32>, vector<16x32xf32> -> vector<16x32xf32>
    %c0_34 = arith.constant 0 : index
    %c0_35 = arith.constant 0 : index
    %c0_36 = arith.constant 0 : index
    %86 = vector.load %arg7[%c0_34, %c0_35, %c0_36] : memref<2x1x32xf32, #tpu.memory_space<vmem>>, vector<1x1x32xf32>
    %87 = vector.shape_cast %86 : vector<1x1x32xf32> to vector<1x32xf32>
    %88 = vector.broadcast %87 : vector<1x32xf32> to vector<16x32xf32>
    %89 = arith.addf %85, %88 : vector<16x32xf32>
    %90 = arith.addf %89, %24 : vector<16x32xf32>
    %c0_37 = arith.constant 0 : index
    %c0_38 = arith.constant 0 : index
    %c0_39 = arith.constant 0 : index
    %91 = vector.load %arg8[%c0_37, %c0_38, %c0_39] : memref<2x1x32xf32, #tpu.memory_space<vmem>>, vector<1x1x32xf32>
    %92 = vector.shape_cast %91 : vector<1x1x32xf32> to vector<1x32xf32>
    %c0_40 = arith.constant 0 : index
    %c0_41 = arith.constant 0 : index
    %c0_42 = arith.constant 0 : index
    %93 = vector.load %arg9[%c0_40, %c0_41, %c0_42] : memref<2x1x32xf32, #tpu.memory_space<vmem>>, vector<1x1x32xf32>
    %94 = vector.shape_cast %93 : vector<1x1x32xf32> to vector<1x32xf32>
    %cst_43 = arith.constant dense<0.000000e+00> : vector<16xf32>
    %95 = vector.multi_reduction <add>, %90, %cst_43 [1] : vector<16x32xf32> to vector<16xf32>
    %96 = vector.shape_cast %95 : vector<16xf32> to vector<16x1xf32>
    %cst_44 = arith.constant 3.200000e+01 : f32
    %97 = vector.broadcast %cst_44 : f32 to vector<16x1xf32>
    %98 = arith.divf %96, %97 : vector<16x1xf32>
    %99 = vector.broadcast %98 : vector<16x1xf32> to vector<16x32xf32>
    %100 = arith.subf %90, %99 : vector<16x32xf32>
    %101 = arith.mulf %100, %100 : vector<16x32xf32>
    %cst_45 = arith.constant dense<0.000000e+00> : vector<16xf32>
    %102 = vector.multi_reduction <add>, %101, %cst_45 [1] : vector<16x32xf32> to vector<16xf32>
    %103 = vector.shape_cast %102 : vector<16xf32> to vector<16x1xf32>
    %cst_46 = arith.constant 3.200000e+01 : f32
    %104 = vector.broadcast %cst_46 : f32 to vector<16x1xf32>
    %105 = arith.divf %103, %104 : vector<16x1xf32>
    %106 = vector.broadcast %98 : vector<16x1xf32> to vector<16x32xf32>
    %107 = arith.subf %90, %106 : vector<16x32xf32>
    %cst_47 = arith.constant 9.99999996E-13 : f32
    %108 = vector.broadcast %cst_47 : f32 to vector<16x1xf32>
    %109 = arith.addf %105, %108 : vector<16x1xf32>
    %110 = math.rsqrt %109 : vector<16x1xf32>
    %111 = vector.broadcast %110 : vector<16x1xf32> to vector<16x32xf32>
    %112 = arith.mulf %107, %111 : vector<16x32xf32>
    %113 = vector.broadcast %92 : vector<1x32xf32> to vector<16x32xf32>
    %114 = arith.mulf %112, %113 : vector<16x32xf32>
    %115 = vector.broadcast %94 : vector<1x32xf32> to vector<16x32xf32>
    %116 = arith.addf %114, %115 : vector<16x32xf32>
    %c0_48 = arith.constant 0 : index
    %c0_49 = arith.constant 0 : index
    %c0_50 = arith.constant 0 : index
    %117 = vector.load %arg10[%c0_48, %c0_49, %c0_50] : memref<2x32x64xf32, #tpu.memory_space<vmem>>, vector<1x32x64xf32>
    %118 = vector.shape_cast %117 : vector<1x32x64xf32> to vector<32x64xf32>
    %cst_51 = arith.constant dense<0.000000e+00> : vector<16x64xf32>
    %119 = tpu.matmul %116, %118, %cst_51 {dimension_numbers = #tpu.dot_dimension_numbers<[1], [0], [0], [1], [0, 0, 1, 1], [], []>} : vector<16x32xf32>, vector<32x64xf32>, vector<16x64xf32> -> vector<16x64xf32>
    %c0_52 = arith.constant 0 : index
    %c0_53 = arith.constant 0 : index
    %c0_54 = arith.constant 0 : index
    %120 = vector.load %arg11[%c0_52, %c0_53, %c0_54] : memref<2x1x64xf32, #tpu.memory_space<vmem>>, vector<1x1x64xf32>
    %121 = vector.shape_cast %120 : vector<1x1x64xf32> to vector<1x64xf32>
    %122 = vector.broadcast %121 : vector<1x64xf32> to vector<16x64xf32>
    %123 = arith.addf %119, %122 : vector<16x64xf32>
    %124 = arith.mulf %123, %123 : vector<16x64xf32>
    %125 = arith.mulf %123, %124 : vector<16x64xf32>
    %cst_55 = arith.constant 4.471500e-02 : f32
    %126 = vector.broadcast %cst_55 : f32 to vector<16x64xf32>
    %127 = arith.mulf %126, %125 : vector<16x64xf32>
    %128 = arith.addf %123, %127 : vector<16x64xf32>
    %cst_56 = arith.constant 0.797884583 : f32
    %129 = vector.broadcast %cst_56 : f32 to vector<16x64xf32>
    %130 = arith.mulf %129, %128 : vector<16x64xf32>
    %131 = math.tanh %130 : vector<16x64xf32>
    %cst_57 = arith.constant 1.000000e+00 : f32
    %132 = vector.broadcast %cst_57 : f32 to vector<16x64xf32>
    %133 = arith.addf %132, %131 : vector<16x64xf32>
    %cst_58 = arith.constant 5.000000e-01 : f32
    %134 = vector.broadcast %cst_58 : f32 to vector<16x64xf32>
    %135 = arith.mulf %134, %133 : vector<16x64xf32>
    %136 = arith.mulf %123, %135 : vector<16x64xf32>
    %c0_59 = arith.constant 0 : index
    %c0_60 = arith.constant 0 : index
    %c0_61 = arith.constant 0 : index
    %137 = vector.load %arg12[%c0_59, %c0_60, %c0_61] : memref<2x64x32xf32, #tpu.memory_space<vmem>>, vector<1x64x32xf32>
    %138 = vector.shape_cast %137 : vector<1x64x32xf32> to vector<64x32xf32>
    %cst_62 = arith.constant dense<0.000000e+00> : vector<16x32xf32>
    %139 = tpu.matmul %136, %138, %cst_62 {dimension_numbers = #tpu.dot_dimension_numbers<[1], [0], [0], [1], [0, 0, 1, 1], [], []>} : vector<16x64xf32>, vector<64x32xf32>, vector<16x32xf32> -> vector<16x32xf32>
    %c0_63 = arith.constant 0 : index
    %c0_64 = arith.constant 0 : index
    %c0_65 = arith.constant 0 : index
    %140 = vector.load %arg13[%c0_63, %c0_64, %c0_65] : memref<2x1x32xf32, #tpu.memory_space<vmem>>, vector<1x1x32xf32>
    %141 = vector.shape_cast %140 : vector<1x1x32xf32> to vector<1x32xf32>
    %142 = vector.broadcast %141 : vector<1x32xf32> to vector<16x32xf32>
    %143 = arith.addf %139, %142 : vector<16x32xf32>
    %144 = arith.addf %143, %116 : vector<16x32xf32>
    %c0_66 = arith.constant 0 : index
    %c0_67 = arith.constant 0 : index
    %c0_68 = arith.constant 0 : index
    %145 = vector.load %arg14[%c0_66, %c0_67, %c0_68] : memref<2x1x32xf32, #tpu.memory_space<vmem>>, vector<1x1x32xf32>
    %146 = vector.shape_cast %145 : vector<1x1x32xf32> to vector<1x32xf32>
    %c0_69 = arith.constant 0 : index
    %c0_70 = arith.constant 0 : index
    %c0_71 = arith.constant 0 : index
    %147 = vector.load %arg15[%c0_69, %c0_70, %c0_71] : memref<2x1x32xf32, #tpu.memory_space<vmem>>, vector<1x1x32xf32>
    %148 = vector.shape_cast %147 : vector<1x1x32xf32> to vector<1x32xf32>
    %cst_72 = arith.constant dense<0.000000e+00> : vector<16xf32>
    %149 = vector.multi_reduction <add>, %144, %cst_72 [1] : vector<16x32xf32> to vector<16xf32>
    %150 = vector.shape_cast %149 : vector<16xf32> to vector<16x1xf32>
    %cst_73 = arith.constant 3.200000e+01 : f32
    %151 = vector.broadcast %cst_73 : f32 to vector<16x1xf32>
    %152 = arith.divf %150, %151 : vector<16x1xf32>
    %153 = vector.broadcast %152 : vector<16x1xf32> to vector<16x32xf32>
    %154 = arith.subf %144, %153 : vector<16x32xf32>
    %155 = arith.mulf %154, %154 : vector<16x32xf32>
    %cst_74 = arith.constant dense<0.000000e+00> : vector<16xf32>
    %156 = vector.multi_reduction <add>, %155, %cst_74 [1] : vector<16x32xf32> to vector<16xf32>
    %157 = vector.shape_cast %156 : vector<16xf32> to vector<16x1xf32>
    %cst_75 = arith.constant 3.200000e+01 : f32
    %158 = vector.broadcast %cst_75 : f32 to vector<16x1xf32>
    %159 = arith.divf %157, %158 : vector<16x1xf32>
    %160 = vector.broadcast %152 : vector<16x1xf32> to vector<16x32xf32>
    %161 = arith.subf %144, %160 : vector<16x32xf32>
    %cst_76 = arith.constant 9.99999996E-13 : f32
    %162 = vector.broadcast %cst_76 : f32 to vector<16x1xf32>
    %163 = arith.addf %159, %162 : vector<16x1xf32>
    %164 = math.rsqrt %163 : vector<16x1xf32>
    %165 = vector.broadcast %164 : vector<16x1xf32> to vector<16x32xf32>
    %166 = arith.mulf %161, %165 : vector<16x32xf32>
    %167 = vector.broadcast %146 : vector<1x32xf32> to vector<16x32xf32>
    %168 = arith.mulf %166, %167 : vector<16x32xf32>
    %169 = vector.broadcast %148 : vector<1x32xf32> to vector<16x32xf32>
    %170 = arith.addf %168, %169 : vector<16x32xf32>
    %c1 = arith.constant 1 : index
    %c0_77 = arith.constant 0 : index
    %c0_78 = arith.constant 0 : index
    %171 = vector.load %arg4[%c1, %c0_77, %c0_78] : memref<2x32x96xf32, #tpu.memory_space<vmem>>, vector<1x32x96xf32>
    %172 = vector.shape_cast %171 : vector<1x32x96xf32> to vector<32x96xf32>
    %cst_79 = arith.constant dense<0.000000e+00> : vector<16x96xf32>
    %173 = tpu.matmul %170, %172, %cst_79 {dimension_numbers = #tpu.dot_dimension_numbers<[1], [0], [0], [1], [0, 0, 1, 1], [], []>} : vector<16x32xf32>, vector<32x96xf32>, vector<16x96xf32> -> vector<16x96xf32>
    %c1_80 = arith.constant 1 : index
    %c0_81 = arith.constant 0 : index
    %c0_82 = arith.constant 0 : index
    %174 = vector.load %arg5[%c1_80, %c0_81, %c0_82] : memref<2x1x96xf32, #tpu.memory_space<vmem>>, vector<1x1x96xf32>
    %175 = vector.shape_cast %174 : vector<1x1x96xf32> to vector<1x96xf32>
    %176 = vector.broadcast %175 : vector<1x96xf32> to vector<16x96xf32>
    %177 = arith.addf %173, %176 : vector<16x96xf32>
    %178 = vector.extract_strided_slice %177 {offsets = [0, 0], sizes = [16, 16], strides = [1, 1]} : vector<16x96xf32> to vector<16x16xf32>
    %179 = vector.shape_cast %178 : vector<16x16xf32> to vector<2x8x16xf32>
    %180 = vector.extract_strided_slice %177 {offsets = [0, 32], sizes = [16, 16], strides = [1, 1]} : vector<16x96xf32> to vector<16x16xf32>
    %181 = vector.shape_cast %180 : vector<16x16xf32> to vector<2x8x16xf32>
    %182 = vector.extract_strided_slice %177 {offsets = [0, 64], sizes = [16, 16], strides = [1, 1]} : vector<16x96xf32> to vector<16x16xf32>
    %183 = vector.shape_cast %182 : vector<16x16xf32> to vector<2x8x16xf32>
    "tpu.trace_start"() <{level = 10 : i32, message = "bqd,bkd->bqk"}> : () -> ()
    %cst_83 = arith.constant dense<0.000000e+00> : vector<2x8x8xf32>
    %184 = tpu.matmul %179, %181, %cst_83 {dimension_numbers = #tpu.dot_dimension_numbers<[2], [2], [1], [1], [0, 0, 0, 1, 1, 1], [0], [0]>} : vector<2x8x16xf32>, vector<2x8x16xf32>, vector<2x8x8xf32> -> vector<2x8x8xf32>
    "tpu.trace_stop"() : () -> ()
    %cst_84 = arith.constant 2.500000e-01 : f32
    %185 = vector.broadcast %cst_84 : f32 to vector<2x8x8xf32>
    %186 = arith.mulf %184, %185 : vector<2x8x8xf32>
    %187 = arith.addf %186, %32 : vector<2x8x8xf32>
    %cst_85 = arith.constant dense<0xFF800000> : vector<2x8xf32>
    %188 = vector.multi_reduction <maximumf>, %187, %cst_85 [2] : vector<2x8x8xf32> to vector<2x8xf32>
    %189 = vector.shape_cast %188 : vector<2x8xf32> to vector<2x8x1xf32>
    %190 = vector.broadcast %189 : vector<2x8x1xf32> to vector<2x8x8xf32>
    %191 = arith.subf %187, %190 : vector<2x8x8xf32>
    %192 = math.exp %191 : vector<2x8x8xf32>
    %cst_86 = arith.constant dense<0.000000e+00> : vector<2x8xf32>
    %193 = vector.multi_reduction <add>, %192, %cst_86 [2] : vector<2x8x8xf32> to vector<2x8xf32>
    %194 = vector.shape_cast %193 : vector<2x8xf32> to vector<2x8x1xf32>
    %195 = vector.broadcast %194 : vector<2x8x1xf32> to vector<2x8x8xf32>
    %196 = arith.divf %192, %195 : vector<2x8x8xf32>
    "tpu.trace_start"() <{level = 10 : i32, message = "bqk,bkd->bqd"}> : () -> ()
    %cst_87 = arith.constant dense<0.000000e+00> : vector<2x8x16xf32>
    %197 = tpu.matmul %196, %183, %cst_87 {dimension_numbers = #tpu.dot_dimension_numbers<[2], [1], [1], [2], [0, 0, 0, 1, 1, 2], [0], [0]>} : vector<2x8x8xf32>, vector<2x8x16xf32>, vector<2x8x16xf32> -> vector<2x8x16xf32>
    "tpu.trace_stop"() : () -> ()
    %198 = vector.shape_cast %197 : vector<2x8x16xf32> to vector<16x16xf32>
    %199 = vector.extract_strided_slice %177 {offsets = [0, 16], sizes = [16, 16], strides = [1, 1]} : vector<16x96xf32> to vector<16x16xf32>
    %200 = vector.shape_cast %199 : vector<16x16xf32> to vector<2x8x16xf32>
    %201 = vector.extract_strided_slice %177 {offsets = [0, 48], sizes = [16, 16], strides = [1, 1]} : vector<16x96xf32> to vector<16x16xf32>
    %202 = vector.shape_cast %201 : vector<16x16xf32> to vector<2x8x16xf32>
    %203 = vector.extract_strided_slice %177 {offsets = [0, 80], sizes = [16, 16], strides = [1, 1]} : vector<16x96xf32> to vector<16x16xf32>
    %204 = vector.shape_cast %203 : vector<16x16xf32> to vector<2x8x16xf32>
    "tpu.trace_start"() <{level = 10 : i32, message = "bqd,bkd->bqk"}> : () -> ()
    %cst_88 = arith.constant dense<0.000000e+00> : vector<2x8x8xf32>
    %205 = tpu.matmul %200, %202, %cst_88 {dimension_numbers = #tpu.dot_dimension_numbers<[2], [2], [1], [1], [0, 0, 0, 1, 1, 1], [0], [0]>} : vector<2x8x16xf32>, vector<2x8x16xf32>, vector<2x8x8xf32> -> vector<2x8x8xf32>
    "tpu.trace_stop"() : () -> ()
    %cst_89 = arith.constant 2.500000e-01 : f32
    %206 = vector.broadcast %cst_89 : f32 to vector<2x8x8xf32>
    %207 = arith.mulf %205, %206 : vector<2x8x8xf32>
    %208 = arith.addf %207, %32 : vector<2x8x8xf32>
    %cst_90 = arith.constant dense<0xFF800000> : vector<2x8xf32>
    %209 = vector.multi_reduction <maximumf>, %208, %cst_90 [2] : vector<2x8x8xf32> to vector<2x8xf32>
    %210 = vector.shape_cast %209 : vector<2x8xf32> to vector<2x8x1xf32>
    %211 = vector.broadcast %210 : vector<2x8x1xf32> to vector<2x8x8xf32>
    %212 = arith.subf %208, %211 : vector<2x8x8xf32>
    %213 = math.exp %212 : vector<2x8x8xf32>
    %cst_91 = arith.constant dense<0.000000e+00> : vector<2x8xf32>
    %214 = vector.multi_reduction <add>, %213, %cst_91 [2] : vector<2x8x8xf32> to vector<2x8xf32>
    %215 = vector.shape_cast %214 : vector<2x8xf32> to vector<2x8x1xf32>
    %216 = vector.broadcast %215 : vector<2x8x1xf32> to vector<2x8x8xf32>
    %217 = arith.divf %213, %216 : vector<2x8x8xf32>
    "tpu.trace_start"() <{level = 10 : i32, message = "bqk,bkd->bqd"}> : () -> ()
    %cst_92 = arith.constant dense<0.000000e+00> : vector<2x8x16xf32>
    %218 = tpu.matmul %217, %204, %cst_92 {dimension_numbers = #tpu.dot_dimension_numbers<[2], [1], [1], [2], [0, 0, 0, 1, 1, 2], [0], [0]>} : vector<2x8x8xf32>, vector<2x8x16xf32>, vector<2x8x16xf32> -> vector<2x8x16xf32>
    "tpu.trace_stop"() : () -> ()
    %219 = vector.shape_cast %218 : vector<2x8x16xf32> to vector<16x16xf32>
    %220 = tpu.concatenate %198, %219 in 1 : vector<16x16xf32>, vector<16x16xf32> -> vector<16x32xf32>
    %c1_93 = arith.constant 1 : index
    %c0_94 = arith.constant 0 : index
    %c0_95 = arith.constant 0 : index
    %221 = vector.load %arg6[%c1_93, %c0_94, %c0_95] : memref<2x32x32xf32, #tpu.memory_space<vmem>>, vector<1x32x32xf32>
    %222 = vector.shape_cast %221 : vector<1x32x32xf32> to vector<32x32xf32>
    %cst_96 = arith.constant dense<0.000000e+00> : vector<16x32xf32>
    %223 = tpu.matmul %220, %222, %cst_96 {dimension_numbers = #tpu.dot_dimension_numbers<[1], [0], [0], [1], [0, 0, 1, 1], [], []>} : vector<16x32xf32>, vector<32x32xf32>, vector<16x32xf32> -> vector<16x32xf32>
    %c1_97 = arith.constant 1 : index
    %c0_98 = arith.constant 0 : index
    %c0_99 = arith.constant 0 : index
    %224 = vector.load %arg7[%c1_97, %c0_98, %c0_99] : memref<2x1x32xf32, #tpu.memory_space<vmem>>, vector<1x1x32xf32>
    %225 = vector.shape_cast %224 : vector<1x1x32xf32> to vector<1x32xf32>
    %226 = vector.broadcast %225 : vector<1x32xf32> to vector<16x32xf32>
    %227 = arith.addf %223, %226 : vector<16x32xf32>
    %228 = arith.addf %227, %170 : vector<16x32xf32>
    %c1_100 = arith.constant 1 : index
    %c0_101 = arith.constant 0 : index
    %c0_102 = arith.constant 0 : index
    %229 = vector.load %arg8[%c1_100, %c0_101, %c0_102] : memref<2x1x32xf32, #tpu.memory_space<vmem>>, vector<1x1x32xf32>
    %230 = vector.shape_cast %229 : vector<1x1x32xf32> to vector<1x32xf32>
    %c1_103 = arith.constant 1 : index
    %c0_104 = arith.constant 0 : index
    %c0_105 = arith.constant 0 : index
    %231 = vector.load %arg9[%c1_103, %c0_104, %c0_105] : memref<2x1x32xf32, #tpu.memory_space<vmem>>, vector<1x1x32xf32>
    %232 = vector.shape_cast %231 : vector<1x1x32xf32> to vector<1x32xf32>
    %cst_106 = arith.constant dense<0.000000e+00> : vector<16xf32>
    %233 = vector.multi_reduction <add>, %228, %cst_106 [1] : vector<16x32xf32> to vector<16xf32>
    %234 = vector.shape_cast %233 : vector<16xf32> to vector<16x1xf32>
    %cst_107 = arith.constant 3.200000e+01 : f32
    %235 = vector.broadcast %cst_107 : f32 to vector<16x1xf32>
    %236 = arith.divf %234, %235 : vector<16x1xf32>
    %237 = vector.broadcast %236 : vector<16x1xf32> to vector<16x32xf32>
    %238 = arith.subf %228, %237 : vector<16x32xf32>
    %239 = arith.mulf %238, %238 : vector<16x32xf32>
    %cst_108 = arith.constant dense<0.000000e+00> : vector<16xf32>
    %240 = vector.multi_reduction <add>, %239, %cst_108 [1] : vector<16x32xf32> to vector<16xf32>
    %241 = vector.shape_cast %240 : vector<16xf32> to vector<16x1xf32>
    %cst_109 = arith.constant 3.200000e+01 : f32
    %242 = vector.broadcast %cst_109 : f32 to vector<16x1xf32>
    %243 = arith.divf %241, %242 : vector<16x1xf32>
    %244 = vector.broadcast %236 : vector<16x1xf32> to vector<16x32xf32>
    %245 = arith.subf %228, %244 : vector<16x32xf32>
    %cst_110 = arith.constant 9.99999996E-13 : f32
    %246 = vector.broadcast %cst_110 : f32 to vector<16x1xf32>
    %247 = arith.addf %243, %246 : vector<16x1xf32>
    %248 = math.rsqrt %247 : vector<16x1xf32>
    %249 = vector.broadcast %248 : vector<16x1xf32> to vector<16x32xf32>
    %250 = arith.mulf %245, %249 : vector<16x32xf32>
    %251 = vector.broadcast %230 : vector<1x32xf32> to vector<16x32xf32>
    %252 = arith.mulf %250, %251 : vector<16x32xf32>
    %253 = vector.broadcast %232 : vector<1x32xf32> to vector<16x32xf32>
    %254 = arith.addf %252, %253 : vector<16x32xf32>
    %c1_111 = arith.constant 1 : index
    %c0_112 = arith.constant 0 : index
    %c0_113 = arith.constant 0 : index
    %255 = vector.load %arg10[%c1_111, %c0_112, %c0_113] : memref<2x32x64xf32, #tpu.memory_space<vmem>>, vector<1x32x64xf32>
    %256 = vector.shape_cast %255 : vector<1x32x64xf32> to vector<32x64xf32>
    %cst_114 = arith.constant dense<0.000000e+00> : vector<16x64xf32>
    %257 = tpu.matmul %254, %256, %cst_114 {dimension_numbers = #tpu.dot_dimension_numbers<[1], [0], [0], [1], [0, 0, 1, 1], [], []>} : vector<16x32xf32>, vector<32x64xf32>, vector<16x64xf32> -> vector<16x64xf32>
    %c1_115 = arith.constant 1 : index
    %c0_116 = arith.constant 0 : index
    %c0_117 = arith.constant 0 : index
    %258 = vector.load %arg11[%c1_115, %c0_116, %c0_117] : memref<2x1x64xf32, #tpu.memory_space<vmem>>, vector<1x1x64xf32>
    %259 = vector.shape_cast %258 : vector<1x1x64xf32> to vector<1x64xf32>
    %260 = vector.broadcast %259 : vector<1x64xf32> to vector<16x64xf32>
    %261 = arith.addf %257, %260 : vector<16x64xf32>
    %262 = arith.mulf %261, %261 : vector<16x64xf32>
    %263 = arith.mulf %261, %262 : vector<16x64xf32>
    %cst_118 = arith.constant 4.471500e-02 : f32
    %264 = vector.broadcast %cst_118 : f32 to vector<16x64xf32>
    %265 = arith.mulf %264, %263 : vector<16x64xf32>
    %266 = arith.addf %261, %265 : vector<16x64xf32>
    %cst_119 = arith.constant 0.797884583 : f32
    %267 = vector.broadcast %cst_119 : f32 to vector<16x64xf32>
    %268 = arith.mulf %267, %266 : vector<16x64xf32>
    %269 = math.tanh %268 : vector<16x64xf32>
    %cst_120 = arith.constant 1.000000e+00 : f32
    %270 = vector.broadcast %cst_120 : f32 to vector<16x64xf32>
    %271 = arith.addf %270, %269 : vector<16x64xf32>
    %cst_121 = arith.constant 5.000000e-01 : f32
    %272 = vector.broadcast %cst_121 : f32 to vector<16x64xf32>
    %273 = arith.mulf %272, %271 : vector<16x64xf32>
    %274 = arith.mulf %261, %273 : vector<16x64xf32>
    %c1_122 = arith.constant 1 : index
    %c0_123 = arith.constant 0 : index
    %c0_124 = arith.constant 0 : index
    %275 = vector.load %arg12[%c1_122, %c0_123, %c0_124] : memref<2x64x32xf32, #tpu.memory_space<vmem>>, vector<1x64x32xf32>
    %276 = vector.shape_cast %275 : vector<1x64x32xf32> to vector<64x32xf32>
    %cst_125 = arith.constant dense<0.000000e+00> : vector<16x32xf32>
    %277 = tpu.matmul %274, %276, %cst_125 {dimension_numbers = #tpu.dot_dimension_numbers<[1], [0], [0], [1], [0, 0, 1, 1], [], []>} : vector<16x64xf32>, vector<64x32xf32>, vector<16x32xf32> -> vector<16x32xf32>
    %c1_126 = arith.constant 1 : index
    %c0_127 = arith.constant 0 : index
    %c0_128 = arith.constant 0 : index
    %278 = vector.load %arg13[%c1_126, %c0_127, %c0_128] : memref<2x1x32xf32, #tpu.memory_space<vmem>>, vector<1x1x32xf32>
    %279 = vector.shape_cast %278 : vector<1x1x32xf32> to vector<1x32xf32>
    %280 = vector.broadcast %279 : vector<1x32xf32> to vector<16x32xf32>
    %281 = arith.addf %277, %280 : vector<16x32xf32>
    %282 = arith.addf %281, %254 : vector<16x32xf32>
    %c1_129 = arith.constant 1 : index
    %c0_130 = arith.constant 0 : index
    %c0_131 = arith.constant 0 : index
    %283 = vector.load %arg14[%c1_129, %c0_130, %c0_131] : memref<2x1x32xf32, #tpu.memory_space<vmem>>, vector<1x1x32xf32>
    %284 = vector.shape_cast %283 : vector<1x1x32xf32> to vector<1x32xf32>
    %c1_132 = arith.constant 1 : index
    %c0_133 = arith.constant 0 : index
    %c0_134 = arith.constant 0 : index
    %285 = vector.load %arg15[%c1_132, %c0_133, %c0_134] : memref<2x1x32xf32, #tpu.memory_space<vmem>>, vector<1x1x32xf32>
    %286 = vector.shape_cast %285 : vector<1x1x32xf32> to vector<1x32xf32>
    %cst_135 = arith.constant dense<0.000000e+00> : vector<16xf32>
    %287 = vector.multi_reduction <add>, %282, %cst_135 [1] : vector<16x32xf32> to vector<16xf32>
    %288 = vector.shape_cast %287 : vector<16xf32> to vector<16x1xf32>
    %cst_136 = arith.constant 3.200000e+01 : f32
    %289 = vector.broadcast %cst_136 : f32 to vector<16x1xf32>
    %290 = arith.divf %288, %289 : vector<16x1xf32>
    %291 = vector.broadcast %290 : vector<16x1xf32> to vector<16x32xf32>
    %292 = arith.subf %282, %291 : vector<16x32xf32>
    %293 = arith.mulf %292, %292 : vector<16x32xf32>
    %cst_137 = arith.constant dense<0.000000e+00> : vector<16xf32>
    %294 = vector.multi_reduction <add>, %293, %cst_137 [1] : vector<16x32xf32> to vector<16xf32>
    %295 = vector.shape_cast %294 : vector<16xf32> to vector<16x1xf32>
    %cst_138 = arith.constant 3.200000e+01 : f32
    %296 = vector.broadcast %cst_138 : f32 to vector<16x1xf32>
    %297 = arith.divf %295, %296 : vector<16x1xf32>
    %298 = vector.broadcast %290 : vector<16x1xf32> to vector<16x32xf32>
    %299 = arith.subf %282, %298 : vector<16x32xf32>
    %cst_139 = arith.constant 9.99999996E-13 : f32
    %300 = vector.broadcast %cst_139 : f32 to vector<16x1xf32>
    %301 = arith.addf %297, %300 : vector<16x1xf32>
    %302 = math.rsqrt %301 : vector<16x1xf32>
    %303 = vector.broadcast %302 : vector<16x1xf32> to vector<16x32xf32>
    %304 = arith.mulf %299, %303 : vector<16x32xf32>
    %305 = vector.broadcast %284 : vector<1x32xf32> to vector<16x32xf32>
    %306 = arith.mulf %304, %305 : vector<16x32xf32>
    %307 = vector.broadcast %286 : vector<1x32xf32> to vector<16x32xf32>
    %308 = arith.addf %306, %307 : vector<16x32xf32>
    %c0_140 = arith.constant 0 : index
    %c0_141 = arith.constant 0 : index
    %309 = vector.load %arg16[%c0_140, %c0_141] : memref<32x48xf32, #tpu.memory_space<vmem>>, vector<32x48xf32>
    %cst_142 = arith.constant dense<0.000000e+00> : vector<16x48xf32>
    %310 = tpu.matmul %308, %309, %cst_142 {dimension_numbers = #tpu.dot_dimension_numbers<[1], [0], [0], [1], [0, 0, 1, 1], [], []>} : vector<16x32xf32>, vector<32x48xf32>, vector<16x48xf32> -> vector<16x48xf32>
    %c0_143 = arith.constant 0 : index
    %c0_144 = arith.constant 0 : index
    %311 = vector.load %arg17[%c0_143, %c0_144] : memref<1x48xf32, #tpu.memory_space<vmem>>, vector<1x48xf32>
    %312 = vector.broadcast %311 : vector<1x48xf32> to vector<16x48xf32>
    %313 = arith.addf %310, %312 : vector<16x48xf32>
    %314 = vector.extract_strided_slice %313 {offsets = [0, 0], sizes = [16, 32], strides = [1, 1]} : vector<16x48xf32> to vector<16x32xf32>
    %315 = vector.extract_strided_slice %313 {offsets = [0, 32], sizes = [16, 16], strides = [1, 1]} : vector<16x48xf32> to vector<16x16xf32>
    %cst_145 = arith.constant 0.000000e+00 : f32
    %316 = vector.broadcast %cst_145 : f32 to vector<16x16xf32>
    %317 = arith.maximumf %315, %316 : vector<16x16xf32>
    %c0_146 = arith.constant 0 : index
    %c0_147 = arith.constant 0 : index
    %318 = vector.load %arg18[%c0_146, %c0_147] : memref<16x32xf32, #tpu.memory_space<vmem>>, vector<16x32xf32>
    %cst_148 = arith.constant dense<0.000000e+00> : vector<16x32xf32>
    %319 = tpu.matmul %317, %318, %cst_148 {dimension_numbers = #tpu.dot_dimension_numbers<[1], [0], [0], [1], [0, 0, 1, 1], [], []>} : vector<16x16xf32>, vector<16x32xf32>, vector<16x32xf32> -> vector<16x32xf32>
    %c0_149 = arith.constant 0 : index
    %c0_150 = arith.constant 0 : index
    %320 = vector.load %arg19[%c0_149, %c0_150] : memref<1x32xf32, #tpu.memory_space<vmem>>, vector<1x32xf32>
    %321 = vector.broadcast %320 : vector<1x32xf32> to vector<16x32xf32>
    %322 = arith.addf %319, %321 : vector<16x32xf32>
    %323 = arith.addf %322, %314 : vector<16x32xf32>
    %c0_151 = arith.constant 0 : index
    %c0_152 = arith.constant 0 : index
    %324 = vector.load %arg20[%c0_151, %c0_152] : memref<16x32xf32, #tpu.memory_space<vmem>>, vector<16x32xf32>
    tpu.vector_store %arg20[%c0_151, %c0_152], %323 {strides = array<i32>} : memref<16x32xf32, #tpu.memory_space<vmem>>, vector<16x32xf32>,
    return
  }
}

</mosaic_0001>

<bundles_post_ra>
// kernel: tpu_custom_call.1
= control target key start
LH: loop header
LB: loop body
LE: loop exit
PB: predicated region body
PF: predicated region fallthrough
CT: control target
= control target key end

     0   :  { %s4067_s0 = inlined_call_operand.hbm [shape: f32[16,32], index: 0, kind: input, shape index: {}]   ;;  %s4068_s1 = inlined_call_operand.hbm [shape: f32[2,8], index: 1, kind: input, shape index: {}]   ;;  %s4069_s2 = inlined_call_operand.hbm [shape: f32[1,32], index: 2, kind: input, shape index: {}]   ;;  %s4070_s3 = inlined_call_operand.hbm [shape: f32[1,32], index: 3, kind: input, shape index: {}]   ;;  %s4071_s4 = inlined_call_operand.vmem [shape: f32[2,32,96], index: 4, kind: input, shape index: {}]   ;;  %s4072_s5 = inlined_call_operand.vmem [shape: f32[2,1,96], index: 5, kind: input, shape index: {}]   ;;  %s4073_s6 = inlined_call_operand.vmem [shape: f32[2,32,32], index: 6, kind: input, shape index: {}]   ;;  %s4074_s7 = inlined_call_operand.hbm [shape: f32[2,1,32], index: 7, kind: input, shape index: {}]   ;;  %s4075_s8 = inlined_call_operand.hbm [shape: f32[2,1,32], index: 8, kind: input, shape index: {}]   ;;  %s4076_s9 = inlined_call_operand.hbm [shape: f32[2,1,32], index: 9, kind: input, shape index: {}]   ;;  %s4077_s10 = inlined_call_operand.vmem [shape: f32[2,32,64], index: 10, kind: input, shape index: {}]   ;;  %s4078_s11 = inlined_call_operand.hbm [shape: f32[2,1,64], index: 11, kind: input, shape index: {}]   ;;  %s4079_s12 = inlined_call_operand.vmem [shape: f32[2,64,32], index: 12, kind: input, shape index: {}]   ;;  %s4080_s13 = inlined_call_operand.vmem [shape: f32[2,1,32], index: 13, kind: input, shape index: {}]   ;;  %s4081_s14 = inlined_call_operand.vmem [shape: f32[2,1,32], index: 14, kind: input, shape index: {}]   ;;  %s4082_s15 = inlined_call_operand.vmem [shape: f32[2,1,32], index: 15, kind: input, shape index: {}]   ;;  %s4083_s16 = inlined_call_operand.hbm [shape: f32[32,48], index: 16, kind: input, shape index: {}]   ;;  %s4084_s17 = inlined_call_operand.vmem [shape: f32[1,48], index: 17, kind: input, shape index: {}]   ;;  %s4085_s18 = inlined_call_operand.vmem [shape: f32[16,32], index: 18, kind: input, shape index: {}]   ;;  %s4086_s19 = inlined_call_operand.vmem [shape: f32[1,32], index: 19, kind: input, shape index: {}]   ;;  %s4087_s20 = inlined_call_operand.hbm [shape: f32[16,32], index: 20, kind: output, shape index: {}]  }
   0x1   :  { %4089 = sst [smem:[#allocation24_spill]] %s4067_s0 }
   0x2   :  { %4090 = sst [smem:[#allocation25_spill]] %s4068_s1 }
   0x3   :  { %4091 = sst [smem:[#allocation26_spill]] %s4069_s2 }
   0x4   :  { %4092 = sst [smem:[#allocation27_spill]] %s4070_s3 }
   0x5   :  { %4093 = sst [smem:[#allocation28_spill]] %s4071_s4 }
   0x6   :  { %25 = vsyncpa [#allocation3], 0 }
   0x7   :  { %26 = vsyncpa [#allocation6], 0 }
   0x8   :  { %27 = vsyncpa [#allocation9], 0 }
   0x9   :  { %28 = vsyncpa [#allocation12], 0 }
   0xa   :  { %29 = vsyncpa [#allocation15], 0 }
   0xb   :  { %30 = vsyncpa [#allocation4], 0  ;;  %s3493_s1 = smov [#allocation5]   ;;  %s3494_s23 = smov [#allocation8]  }
   0xc   :  { %s49_s22 = sshll.u32 %s3493_s1, 4  ;;  %s69_s24 = sshll.u32 %s3494_s23, 4  ;;  %s50_s22 = int_to_ptr.vmem [resolvable:$true] %s49_s22  ;;  %s70_s24 = int_to_ptr.vmem [resolvable:$true] %s69_s24 }
   0xd   :  { %s3289_s2 = scalar_lea.vmem %s50_s22, 32  ;;  %p3294_p1 = scmp.lt.s32.totalorder %s50_s22, %s50_s22 }
   0xe   :  { %p3290_p0 = scmp.ne.s32.totalorder %s50_s22, %s3289_s2  ;;  %p3295_p2 = scmp.lt.s32.totalorder %s3289_s2, %s3289_s2 }
  0x10   :  { %p3296_p3 = por %p3295_p2, %p3294_p1 }
  0x12   :  { %p3297_p4 = pnand %p3296_p3, %p3290_p0 }
  0x14   :  { %3300 = shalt.err (!%p3297_p4)
}
  0x15   :  { %s4094_s26 = sld [smem:[#allocation25_spill]]  ;;  %s3309_s27 = scalar_lea.vmem %s70_s24, 16 }
  0x16   :  { %p3310_p5 = scmp.ne.s32.totalorder %s70_s24, %s3309_s27  ;;  %s3313_s28 = scalar_lea.vmem %s70_s24, 32 }
  0x17   :  { %p3314_p6 = scmp.lt.s32.totalorder %s70_s24, %s70_s24  ;;  %p3315_p7 = scmp.lt.s32.totalorder %s3313_s28, %s3309_s27 }
  0x19   :  { %p3316_p8 = por %p3315_p7, %p3314_p6 }
  0x1b   :  { %52 = dma.hbm_to_vmem [thread:$0]  %s4094_s26, 32, %s50_s22, [#allocation6]  }
  0x1c   :  { %p3317_p9 = pnand %p3316_p8, %p3310_p5 }
  0x1e   :  { %3320 = shalt.err (!%p3317_p9)
}
  0x1f   :  { %s4095_s30 = sld [smem:[#allocation27_spill]]  ;;  %s3495_s0 = smov [#allocation11]  }
  0x20   :  { %s96_s21 = sshll.u32 %s3495_s0, 4  ;;  %s3496_s1 = smov [#allocation14]   ;;  %s97_s21 = int_to_ptr.vmem [resolvable:$true] %s96_s21 }
  0x21   :  { %s122_s23 = sshll.u32 %s3496_s1, 4  ;;  %s3329_s2 = scalar_lea.vmem %s97_s21, 32  ;;  %s123_s23 = int_to_ptr.vmem [resolvable:$true] %s122_s23 }
  0x22   :  { %p3330_p10 = scmp.ne.s32.totalorder %s97_s21, %s3329_s2  ;;  %p3334_p11 = scmp.lt.s32.totalorder %s97_s21, %s97_s21 }
  0x23   :  { %p3335_p12 = scmp.lt.s32.totalorder %s3329_s2, %s3329_s2 }
  0x25   :  { %72 = dma.hbm_to_vmem [thread:$0]  %s4095_s30, 16, %s70_s24, [#allocation9]  }
  0x26   :  { %p3336_p13 = por %p3335_p12, %p3334_p11 }
  0x28   :  { %p3337_p0 = pnand %p3336_p13, %p3330_p10 }
  0x2a   :  { %3340 = shalt.err (!%p3337_p0)
}
  0x2b   :  { %s3497_s22 = smov 16   ;;  %s3498_s25 = smov 1  }
  0x2c   :  { %102 = dma.hbm_to_vmem [thread:$0]  %s4075_s8, 32, %s97_s21, [#allocation12], %s3497_s22, %s3497_s22, %s3498_s25  }
  0x2d   :  { %s3349_s26 = scalar_lea.vmem %s123_s23, 32  ;;  %p3354_p2 = scmp.lt.s32.totalorder %s123_s23, %s123_s23 }
  0x2e   :  { %p3350_p1 = scmp.ne.s32.totalorder %s123_s23, %s3349_s26  ;;  %p3355_p3 = scmp.lt.s32.totalorder %s3349_s26, %s3349_s26 }
  0x30   :  { %p3356_p4 = por %p3355_p3, %p3354_p2 }
  0x32   :  { %p3357_p5 = pnand %p3356_p4, %p3350_p1 }
  0x34   :  { %3360 = shalt.err (!%p3357_p5)
}
  0x35   :  { %128 = dma.hbm_to_vmem [thread:$0]  %s4078_s11, 32, %s123_s23, [#allocation15], %s3497_s22, %s3497_s22, %s3498_s25  }
  0x36   :  { %s3499_s4 = smov [#allocation2]  }
  0x37   :  { %s36_s29 = sshll.u32 %s3499_s4, 4  ;;  %s37_s29 = int_to_ptr.vmem [resolvable:$true] %s36_s29 }
  0x38   :  { %s3369_s30 = scalar_lea.vmem %s37_s29, 256  ;;  %p3374_p7 = scmp.lt.s32.totalorder %s37_s29, %s37_s29 }
  0x39   :  { %p3370_p6 = scmp.ne.s32.totalorder %s37_s29, %s3369_s30  ;;  %p3375_p8 = scmp.lt.s32.totalorder %s3369_s30, %s3369_s30 }
  0x3b   :  { %p3376_p9 = por %p3375_p8, %p3374_p7 }
  0x3d   :  { %p3377_p10 = pnand %p3376_p9, %p3370_p6 }
  0x3f   :  { %3380 = shalt.err (!%p3377_p10)
}
  0x40   :  { %s3500_s8 = smov 128   ;;  %s3501_s0 = smov 8  }
  0x41   :  { %s4096_s2 = sld [smem:[#allocation24_spill]]  ;;  %s3502_s11 = smov [#allocation7]  }
  0x42   :  { %s59_s23 = sshll.u32 %s3502_s11, 4  ;;  %s3503_s3 = smov [#allocation10]   ;;  %s60_s23 = int_to_ptr.vmem [resolvable:$true] %s59_s23 }
  0x43   :  { %s84_s24 = sshll.u32 %s3503_s3, 4  ;;  %s3389_s26 = scalar_lea.vmem %s60_s23, 16  ;;  %s85_s24 = int_to_ptr.vmem [resolvable:$true] %s84_s24 }
  0x44   :  { %p3390_p11 = scmp.ne.s32.totalorder %s60_s23, %s3389_s26  ;;  %s3393_s27 = scalar_lea.vmem %s60_s23, 32 }
  0x45   :  { %p3394_p12 = scmp.lt.s32.totalorder %s60_s23, %s60_s23  ;;  %p3395_p13 = scmp.lt.s32.totalorder %s3393_s27, %s3389_s26 }
  0x47   :  { %42 = dma.hbm_to_vmem [thread:$0]  %s4096_s2, 256, %s37_s29, [#allocation3], %s3500_s8, %s3500_s8, %s3501_s0  }
  0x48   :  { %p3396_p0 = por %p3395_p13, %p3394_p12 }
  0x4a   :  { %p3397_p1 = pnand %p3396_p0, %p3390_p11 }
  0x4c   :  { %3400 = shalt.err (!%p3397_p1)
}
  0x4d   :  { %s4097_s30 = sld [smem:[#allocation26_spill]]  ;;  %s3409_s21 = scalar_lea.vmem %s85_s24, 32 }
  0x4e   :  { %p3410_p2 = scmp.ne.s32.totalorder %s85_s24, %s3409_s21  ;;  %p3414_p3 = scmp.lt.s32.totalorder %s85_s24, %s85_s24 }
  0x4f   :  { %p3415_p4 = scmp.lt.s32.totalorder %s3409_s21, %s3409_s21 }
  0x51   :  { %p3416_p5 = por %p3415_p4, %p3414_p3 }
  0x53   :  { %62 = dma.hbm_to_vmem [thread:$0]  %s4097_s30, 16, %s60_s23, [#allocation6]  }
  0x54   :  { %p3417_p6 = pnand %p3416_p5, %p3410_p2 }
  0x56   :  { %3420 = shalt.err (!%p3417_p6)
}
  0x57   :  { %90 = dma.hbm_to_vmem [thread:$0]  %s4074_s7, 32, %s85_s24, [#allocation9], %s3497_s22, %s3497_s22, %s3498_s25  }
  0x58   :  { %s3504_s2 = smov [#allocation13]   ;;  %s3505_s3 = smov [#allocation16]  }
  0x59   :  { %s108_s11 = sshll.u32 %s3504_s2, 4  ;;  %s142_s23 = sshll.u32 %s3505_s3, 4  ;;  %s109_s11 = int_to_ptr.vmem [resolvable:$true] %s108_s11  ;;  %s143_s23 = int_to_ptr.vmem [resolvable:$true] %s142_s23 }
  0x5a   :  { %s3429_s26 = scalar_lea.vmem %s109_s11, 32  ;;  %p3434_p8 = scmp.lt.s32.totalorder %s109_s11, %s109_s11 }
  0x5b   :  { %p3430_p7 = scmp.ne.s32.totalorder %s109_s11, %s3429_s26  ;;  %p3435_p9 = scmp.lt.s32.totalorder %s3429_s26, %s3429_s26 }
  0x5d   :  { %p3436_p10 = por %p3435_p9, %p3434_p8 }
  0x5f   :  { %p3437_p11 = pnand %p3436_p10, %p3430_p7 }
  0x61   :  { %3440 = shalt.err (!%p3437_p11)
}
  0x62   :  { %114 = dma.hbm_to_vmem [thread:$0]  %s4076_s9, 32, %s109_s11, [#allocation12], %s3497_s22, %s3497_s22, %s3498_s25  }
  0x63   :  { %s3449_s7 = scalar_lea.vmem %s143_s23, 512  ;;  %p3454_p13 = scmp.lt.s32.totalorder %s143_s23, %s143_s23 }
  0x64   :  { %p3450_p12 = scmp.ne.s32.totalorder %s143_s23, %s3449_s7  ;;  %p3455_p0 = scmp.lt.s32.totalorder %s3449_s7, %s3449_s7 }
  0x66   :  { %p3456_p1 = por %p3455_p0, %p3454_p13 }
  0x68   :  { %p3457_p2 = pnand %p3456_p1, %p3450_p12 }
  0x6a   :  { %3460 = shalt.err (!%p3457_p2)
}
  0x6b   :  { %148 = dma.hbm_to_vmem [thread:$0]  %s4083_s16, 512, %s143_s23, [#allocation15], %s3500_s8, %s3500_s8, %s3501_s0  }
  0x6c   :  { %3481 = dma.done.wait [#allocation3], 256  }
  0x6d   :  { %3482 = vsyncadd [#allocation3], 4294967040 }
  0x6e   :  { %3483 = dma.done.wait [#allocation6], 48  }
  0x6f   :  { %3484 = vsyncadd [#allocation6], 4294967248 }
  0x70   :  { %3485 = dma.done.wait [#allocation9], 48  }
  0x71   :  { %3486 = vsyncadd [#allocation9], 4294967248 }
  0x72   :  { %3487 = dma.done.wait [#allocation12], 64  }
  0x73   :  { %3488 = vsyncadd [#allocation12], 4294967232 }
  0x74   :  { %3489 = dma.done.wait [#allocation15], 544  }
  0x75   :  { %3490 = vsyncadd [#allocation15], 4294966752  ;;  %vm186_vm0 = vcmask 261120   ;;  %v182_v0 = vld [vmem:[#allocation2] sm:$0xff]  ;;  %v183_v1 = vld [vmem:[#allocation2 + $0x8] sm:$0xff]  ;;  %s4098_s25 = sld [smem:[#allocation28_spill]]  ;;  %v237_v44 = vlaneseq }
  0x76   :  { %v187_v2 = vsel %vm186_vm0, %v182_v0, 0.0  ;;  %v190_v3 = vsel %vm186_vm0, %v183_v1, 0.0  ;;  %v2810_v25 = vld [vmem:[#allocation7] ss:$0 sm:$0xff]  ;;  %v2811_v27 = vld [vmem:[#allocation8] ss:$0 sm:$0xff] }
  0x77   :  { %188 = vadd.xlane.f32.xlu0 %v187_v2  ;;  %v3506_v34 = vmov 0.0   ;;  %vm3507_vm1 = vmmov 0   ;;  %v2813_v35 = vld [vmem:[%s4072_s5] ss:$0 sm:$0xff]  ;;  %s3508_s26 = smov 96   ;;  %vm361_vm2 = vcmask 130048  }
  0x78   :  { %3008 = vmatprep.subr.mxu1 %v3506_v34  ;;  %3010 = vmatprep.mubr.msk.f32.mxu1 %vm3507_vm1, %v3506_v34  ;;  %v3509_v42 = vmov 1966171168   ;;  %v230_v45 = vld [vmem:[#allocation5] sm:$0x3]  ;;  %v238_v48 = vshrl.u32 %v237_v44, 7  ;;  %vm517_vm3 = vcmask 64512  }
  0x79   :  { %v235_v43 = vunpack.c.l.s4 %v3509_v42  ;;  %v2812_v46 = vadd.f32 -1.0, %v230_v45  ;;  %s3510_s27 = smov 64   ;;  %s3511_s28 = smov 80   ;;  %vm1299_vm4 = vcmask 523264  }
  0x7a   :  { %v258_v53 = vsub.s32 0, %v238_v48  ;;  %s3512_s7 = smov 112   ;;  %s3513_s24 = smov 48  }
  0x7b   :  { %191 = vadd.xlane.f32.xlu0 %v190_v3  ;;  %v269_v14 = vld [vmem:[%s4098_s25 + $0x18] sm:$0xff]  ;;  %v268_v15 = vld [vmem:[%s4098_s25 + $0x10] sm:$0xff]  ;;  %v267_v16 = vld [vmem:[%s4098_s25 + $0x8] sm:$0xff]  ;;  %v236_v47 = vunpack.c.0.s8 %v235_v43  ;;  %v232_v49 = vmul.f32 10000.0, %v2812_v46 }
  0x7c   :  { %2997 = vmatprep.subr.mxu0 %v269_v14  ;;  %v266_v17 = vld [vmem:[%s4098_s25] sm:$0xff] }
  0x7d   :  { %2998 = vmatpush3.msra.mxu0 %v269_v14  ;;  %v239_v50 = vsub.s32 %v236_v47, %v238_v48 }
  0x7e   :  { %2999 = vmatprep.subr.mxu0 %v268_v15 }
  0x7f   :  { %3000 = vmatpush3.msra.mxu0 %v268_v15  ;;  %v240_v51 = vrot.slane %v232_v49, %v239_v50 }
  0x80   :  { %3001 = vmatprep.subr.mxu0 %v267_v16 }
  0x81   :  { %3002 = vmatpush3.msra.mxu0 %v267_v16  ;;  %v248_v52 = vrot.slane %v240_v51, %v239_v50  ;;  %v241_v54 = vcombine.high %v240_v51, %v240_v51 }
  0x82   :  { %3003 = vmatprep.subr.mxu0 %v266_v17 }
  0x83   :  { %3004 = vmatpush3.msra.mxu0 %v266_v17  ;;  %v3718_v55 = vrot.slane %v248_v52, %v258_v53  ;;  %v255_v56 = vrot.slane %v241_v54, %v239_v50 }
  0x84   :  { %3018 = vmatprep.subr.mxu0 %v3506_v34 }
  0x85   :  { %v3721_v61 = vrot.slane %v255_v56, %v258_v53 }
 0x100   :  { %v189_v4 = vpop.xlane.xlu0 %188 }
 0x101   :  { %v194_v5 = vmul.f32 0.03125, %v189_v4 }
 0x103   :  { %v196_v6 = vsub.f32 %v182_v0, %v194_v5 }
 0x104   :  { %v192_v7 = vpop.xlane.xlu0 %191 }
 0x105   :  { %v195_v8 = vmul.f32 0.03125, %v192_v7  ;;  %v198_v9 = vmul.f32 %v196_v6, %v196_v6 }
 0x107   :  { %v197_v10 = vsub.f32 %v183_v1, %v195_v8  ;;  %v200_v11 = vsel %vm186_vm0, %v198_v9, 0.0 }
 0x108   :  { %201 = vadd.xlane.f32.xlu1 %v200_v11 }
 0x109   :  { %v199_v12 = vmul.f32 %v197_v10, %v197_v10 }
 0x10b   :  { %v203_v13 = vsel %vm186_vm0, %v199_v12, 0.0 }
 0x10c   :  { %204 = vadd.xlane.f32.xlu1 %v203_v13 }
 0x191   :  { %v202_v18 = vpop.xlane.xlu1 %201 }
 0x192   :  { %v206_v19 = vmul.f32 0.03125, %v202_v18 }
 0x194   :  { %v208_v20 = vadd.f32 1e-12, %v206_v19 }
 0x195   :  { %v205_v21 = vpop.xlane.xlu1 %204 }
 0x196   :  { %3221 = vrsqrt.f32 %v208_v20  ;;  %v207_v22 = vmul.f32 0.03125, %v205_v21 }
 0x198   :  { %v209_v23 = vadd.f32 1e-12, %v207_v22 }
 0x19a   :  { %3223 = vrsqrt.f32 %v209_v23 }
 0x1a3   :  { %v3222_v24 = vpop.eup %3221 }
 0x1a4   :  { %v212_v26 = vmul.f32 %v3222_v24, %v196_v6 }
 0x1a6   :  { %v220_v28 = vmul.f32 %v2810_v25, %v212_v26 }
 0x1a7   :  { %v3224_v29 = vpop.eup %3223 }
 0x1a8   :  { %v213_v30 = vmul.f32 %v3224_v29, %v197_v10  ;;  %v3681_v31 = vadd.f32 %v2811_v27, %v220_v28 }
 0x1aa   :  { %v221_v32 = vmul.f32 %v2810_v25, %v213_v30  ;;  %3005 = vmatprep.mubr.msk.f32.mxu0 %vm186_vm0, %v3681_v31 }
 0x1ac   :  { %v3685_v33 = vadd.f32 %v2811_v27, %v221_v32 }
 0x1ae   :  { %3006 = vmatmul.mubr.msk.f32.vlgmr.msra.gmra.mxu0 %vm186_vm0, %v3685_v33 }
 0x1af   :  { %3020 = vmatprep.mubr.msk.f32.mxu0 %vm3507_vm1, %v3506_v34 }
 0x26e   :  { %v3007_v36 = vpop.f32.mrf.mxu0 }
 0x26f   :  { %v3698_v37 = vadd.f32 %v3007_v36, %v2813_v35 }
 0x270   :  { %v349_v38 = vpop.f32.mrf.mxu0 }
 0x271   :  { %v3700_v39 = vadd.f32 %v2813_v35, %v349_v38  ;;  %437 = vrot.lane.b32.xlu1 %v3698_v37, %s3508_s26 }
 0x273   :  { %359 = vrot.lane.b32.xlu0 %v3700_v39, %s3508_s26 }
 0x2e3   :  { %v438_v41 = vpop.permute.xlu1 %437 }
 0x2e5   :  { %v360_v40 = vpop.permute.xlu0 %359 }
 0x2e6   :  { %3009 = vmatpush3.xpose.msk.msra.mxu1 %vm361_vm2, %v360_v40 }
 0x2e7   :  { %3013 = vmatprep.subr.mxu1 %v3506_v34 }
 0x2e9   :  { %3011 = vmatmul.mubr.msk.f32.vlgmr.msra.gmra.mxu1 %vm361_vm2, %v3700_v39 }
 0x2ea   :  { %3014 = vmatpush3.xpose.msk.msra.mxu1 %vm361_vm2, %v438_v41  ;;  %3015 = vmatprep.mubr.msk.f32.mxu1 %vm3507_vm1, %v3506_v34 }
 0x2eb   :  { %3023 = vmatprep.subr.mxu1 %v3506_v34 }
 0x2ed   :  { %3016 = vmatmul.mubr.msk.f32.vlgmr.msra.gmra.mxu1 %vm361_vm2, %v3698_v37 }
 0x2ee   :  { %3025 = vmatprep.mubr.msk.f32.mxu1 %vm3507_vm1, %v3506_v34 }
 0x3a9   :  { %v432_v57 = vpop.f32.mrf.mxu1 }
 0x3aa   :  { %v513_v58 = vmul.f32 0.25, %v432_v57 }
 0x3ab   :  { %v3012_v59 = vpop.f32.mrf.mxu1 }
 0x3ac   :  { %v515_v60 = vadd.f32 %v513_v58, %v3718_v55 }
 0x3ad   :  { %v509_v62 = vpop.f32.mrf.mxu1 }
 0x3ae   :  { %v514_v63 = vmul.f32 0.25, %v509_v62  ;;  %v518_v0 = vsel %vm517_vm3, %v515_v60, -inf }
 0x3af   :  { %519 = vmax.xlane.f32.xlu1 %v518_v0  ;;  %v3017_v1 = vpop.f32.mrf.mxu1  ;;  %v1039_v0 = vld [vmem:[%s4073_s6 + $0x18] sm:$0xff] }
 0x3b0   :  { %v516_v2 = vadd.f32 %v514_v63, %v3721_v61  ;;  %v1037_v1 = vld [vmem:[%s4073_s6 + $0x8] sm:$0xff] }
 0x3b2   :  { %v521_v3 = vsel %vm517_vm3, %v516_v2, -inf }
 0x3b3   :  { %522 = vmax.xlane.f32.xlu0 %v521_v3 }
 0x3c0   :  { %616 = vrot.lane.b32.xlu1 %v3698_v37, %s3510_s27 }
 0x3c4   :  { %694 = vrot.lane.b32.xlu1 %v3700_v39, %s3511_s28 }
 0x3c8   :  { %772 = vrot.lane.b32.xlu1 %v3698_v37, %s3511_s28 }
 0x438   :  { %v520_v4 = vpop.xlane.xlu1 %519 }
 0x439   :  { %v524_v5 = vsub.f32 %v515_v60, %v520_v4 }
 0x43b   :  { %v526_v6 = vmul.f32 1.442695, %v524_v5 }
 0x43c   :  { %v617_v7 = vpop.permute.xlu1 %616  ;;  %v523_v8 = vpop.xlane.xlu0 %522 }
 0x43d   :  { %3225 = vpow2.f32 %v526_v6  ;;  %v525_v9 = vsub.f32 %v516_v2, %v523_v8  ;;  %3024 = vmatpush3.msra.mxu1 %v617_v7  ;;  %v1036_v2 = vld [vmem:[%s4073_s6] sm:$0xff] }
 0x43e   :  { %3033 = vmatprep.subr.mxu1 %v3506_v34 }
 0x43f   :  { %v528_v10 = vmul.f32 1.442695, %v525_v9 }
 0x440   :  { %v695_v15 = vpop.permute.xlu1 %694 }
 0x441   :  { %3227 = vpow2.f32 %v528_v10 }
 0x444   :  { %v773_v16 = vpop.permute.xlu1 %772 }
 0x44a   :  { %v3226_v11 = vpop.eup %3225 }
 0x44b   :  { %v530_v12 = vsel %vm517_vm3, %v3226_v11, 0.0 }
 0x44c   :  { %531 = vadd.xlane.f32.xlu0 %v530_v12 }
 0x44e   :  { %v3228_v13 = vpop.eup %3227 }
 0x44f   :  { %v533_v14 = vsel %vm517_vm3, %v3228_v13, 0.0 }
 0x450   :  { %534 = vadd.xlane.f32.xlu1 %v533_v14 }
 0x461   :  { %770 = vrot.lane.b32.xlu1 %v3698_v37, %s3512_s7 }
 0x462   :  { %540 = vrot.lane.b32.xlu0 %v3700_v39, %s3510_s27 }
 0x466   :  { %692 = vrot.lane.b32.xlu0 %v3700_v39, %s3512_s7 }
 0x4d5   :  { %v532_v17 = vpop.xlane.xlu0 %531 }
 0x4d6   :  { %3229 = vrcp.f32 %v532_v17 }
 0x4d9   :  { %v535_v18 = vpop.xlane.xlu1 %534  ;;  %v541_v19 = vpop.permute.xlu0 %540 }
 0x4da   :  { %3231 = vrcp.f32 %v535_v18  ;;  %3019 = vmatpush3.msra.mxu0 %v541_v19 }
 0x4db   :  { %3028 = vmatprep.subr.mxu0 %v3506_v34 }
 0x4dd   :  { %v693_v24 = vpop.permute.xlu0 %692  ;;  %v771_v25 = vpop.permute.xlu1 %770 }
 0x4e3   :  { %v3230_v20 = vpop.eup %3229 }
 0x4e4   :  { %v537_v21 = vmul.f32 %v3230_v20, %v3226_v11  ;;  %v2828_v11 = vld [vmem:[#allocation10] ss:$0 sm:$0xff] }
 0x4e6   :  { %3021 = vmatmul.mubr.msk.f32.vlgmr.msra.gmra.mxu0 %vm517_vm3, %v537_v21 }
 0x4e7   :  { %v3232_v22 = vpop.eup %3231  ;;  %3029 = vmatpush3.xpose.msk.msra.mxu0 %vm361_vm2, %v695_v15  ;;  %3030 = vmatprep.mubr.msk.f32.mxu0 %vm3507_vm1, %v3506_v34 }
 0x4e8   :  { %v539_v23 = vmul.f32 %v3232_v22, %v3228_v13  ;;  %3038 = vmatprep.subr.mxu0 %v3506_v34 }
 0x4ea   :  { %3026 = vmatmul.mubr.msk.f32.vlgmr.msra.gmra.mxu1 %vm517_vm3, %v539_v23  ;;  %3031 = vmatmul.mubr.msk.f32.vlgmr.msra.gmra.mxu0 %vm361_vm2, %v693_v24 }
 0x4eb   :  { %3034 = vmatpush3.xpose.msk.msra.mxu1 %vm361_vm2, %v773_v16  ;;  %3035 = vmatprep.mubr.msk.f32.mxu1 %vm3507_vm1, %v3506_v34 }
 0x4ec   :  { %3043 = vmatprep.subr.mxu1 %v3506_v34  ;;  %3040 = vmatprep.mubr.msk.f32.mxu0 %vm3507_vm1, %v3506_v34 }
 0x4ee   :  { %3036 = vmatmul.mubr.msk.f32.vlgmr.msra.gmra.mxu1 %vm361_vm2, %v771_v25 }
 0x4ef   :  { %3045 = vmatprep.mubr.msk.f32.mxu1 %vm3507_vm1, %v3506_v34 }
 0x5a6   :  { %v3758_v26 = vpop.f32.mrf.mxu0 }
 0x5a8   :  { %v3022_v27 = vpop.f32.mrf.mxu0 }
 0x5aa   :  { %v3760_v28 = vpop.f32.mrf.mxu1  ;;  %v766_v29 = vpop.f32.mrf.mxu0 }
 0x5ab   :  { %v848_v30 = vmul.f32 0.25, %v766_v29  ;;  %v1176_v29 = vld [vmem:[%s4077_s10 + $0x10] sm:$0xff] }
 0x5ac   :  { %v3027_v32 = vpop.f32.mrf.mxu1  ;;  %v3032_v35 = vpop.f32.mrf.mxu0 }
 0x5ad   :  { %v850_v36 = vadd.f32 %v848_v30, %v3718_v55  ;;  %v1175_v30 = vld [vmem:[%s4077_s10 + $0x8] sm:$0xff]  ;;  %v1174_v32 = vld [vmem:[%s4077_s10] sm:$0xff] }
 0x5ae   :  { %v844_v38 = vpop.f32.mrf.mxu1 }
 0x5af   :  { %v849_v40 = vmul.f32 0.25, %v844_v38  ;;  %v852_v41 = vsel %vm517_vm3, %v850_v36, -inf }
 0x5b0   :  { %853 = vmax.xlane.f32.xlu0 %v852_v41  ;;  %v3037_v42 = vpop.f32.mrf.mxu1 }
 0x5b1   :  { %v851_v43 = vadd.f32 %v849_v40, %v3721_v61 }
 0x5b3   :  { %v855_v44 = vsel %vm517_vm3, %v851_v43, -inf }
 0x5b4   :  { %856 = vmax.xlane.f32.xlu1 %v855_v44  ;;  %v2831_v44 = vld [vmem:[#allocation11] ss:$0 sm:$0xff] }
 0x5c5   :  { %950 = vrot.lane.b32.xlu1 %v3698_v37, %s3513_s24 }
 0x639   :  { %v854_v45 = vpop.xlane.xlu0 %853 }
 0x63a   :  { %v858_v46 = vsub.f32 %v850_v36, %v854_v45 }
 0x63c   :  { %v860_v47 = vmul.f32 1.442695, %v858_v46  ;;  %v2832_v46 = vld [vmem:[#allocation13] ss:$0 sm:$0xff] }
 0x63d   :  { %v857_v48 = vpop.xlane.xlu1 %856 }
 0x63e   :  { %3233 = vpow2.f32 %v860_v47  ;;  %v859_v49 = vsub.f32 %v851_v43, %v857_v48 }
 0x640   :  { %v862_v50 = vmul.f32 1.442695, %v859_v49 }
 0x641   :  { %v951_v51 = vpop.permute.xlu1 %950 }
 0x642   :  { %3235 = vpow2.f32 %v862_v50  ;;  %3044 = vmatpush3.msra.mxu1 %v951_v51 }
 0x64b   :  { %v3234_v52 = vpop.eup %3233 }
 0x64c   :  { %v864_v53 = vsel %vm517_vm3, %v3234_v52, 0.0 }
 0x64d   :  { %865 = vadd.xlane.f32.xlu0 %v864_v53  ;;  %v1291_v53 = vld [vmem:[%s4079_s12 + $0x38] sm:$0xff] }
 0x64f   :  { %v3236_v54 = vpop.eup %3235 }
 0x650   :  { %v867_v56 = vsel %vm517_vm3, %v3236_v54, 0.0 }
 0x651   :  { %868 = vadd.xlane.f32.xlu0 %v867_v56  ;;  %v1289_v56 = vld [vmem:[%s4079_s12 + $0x28] sm:$0xff] }
 0x667   :  { %874 = vrot.lane.b32.xlu0 %v3700_v39, %s3513_s24  ;;  %v1038_v39 = vld [vmem:[%s4073_s6 + $0x10] sm:$0xff] }
 0x6d6   :  { %v866_v37 = vpop.xlane.xlu0 %865 }
 0x6d7   :  { %3237 = vrcp.f32 %v866_v37  ;;  %v1288_v37 = vld [vmem:[%s4079_s12 + $0x20] sm:$0xff] }
 0x6da   :  { %v869_v57 = vpop.xlane.xlu0 %868 }
 0x6db   :  { %3239 = vrcp.f32 %v869_v57  ;;  %v1287_v57 = vld [vmem:[%s4079_s12 + $0x18] sm:$0xff] }
 0x6de   :  { %v875_v58 = vpop.permute.xlu0 %874 }
 0x6df   :  { %3039 = vmatpush3.msra.mxu0 %v875_v58  ;;  %v1286_v58 = vld [vmem:[%s4079_s12 + $0x10] sm:$0xff] }
 0x6e0   :  { %3048 = vmatprep.subr.mxu0 %v1039_v0 }
 0x6e4   :  { %v3238_v59 = vpop.eup %3237 }
 0x6e5   :  { %v871_v60 = vmul.f32 %v3238_v59, %v3234_v52  ;;  %v1285_v59 = vld [vmem:[%s4079_s12 + $0x8] sm:$0xff] }
 0x6e7   :  { %3041 = vmatmul.mubr.msk.f32.vlgmr.msra.gmra.mxu0 %vm517_vm3, %v871_v60  ;;  %v1284_v60 = vld [vmem:[%s4079_s12] sm:$0xff] }
 0x6e8   :  { %v3240_v62 = vpop.eup %3239  ;;  %3049 = vmatpush3.msra.mxu0 %v1039_v0 }
 0x6e9   :  { %v873_v63 = vmul.f32 %v3240_v62, %v3236_v54  ;;  %3050 = vmatprep.subr.mxu0 %v1038_v39  ;;  %v1290_v54 = vld [vmem:[%s4079_s12 + $0x30] sm:$0xff]  ;;  %v2833_v62 = vld [vmem:[#allocation14] ss:$0 sm:$0xff] }
 0x6ea   :  { %3051 = vmatpush3.msra.mxu0 %v1038_v39 }
 0x6eb   :  { %3046 = vmatmul.mubr.msk.f32.vlgmr.msra.gmra.mxu1 %vm517_vm3, %v873_v63  ;;  %3052 = vmatprep.subr.mxu0 %v1037_v1 }
 0x6ec   :  { %3053 = vmatpush3.msra.mxu0 %v1037_v1 }
 0x6ed   :  { %3054 = vmatprep.subr.mxu0 %v1036_v2 }
 0x6ee   :  { %3055 = vmatpush3.msra.mxu0 %v1036_v2 }
 0x6ef   :  { %3070 = vmatprep.subr.mxu0 %v1291_v53 }
 0x7a7   :  { %v946_v3 = vpop.f32.mrf.mxu0 }
 0x7a8   :  { %1028 = vrot.lane.b32.xlu1 %v946_v3, %s3497_s22 }
 0x7a9   :  { %v3042_v4 = vpop.f32.mrf.mxu0 }
 0x7ab   :  { %v1022_v5 = vpop.f32.mrf.mxu1 }
 0x7ac   :  { %1030 = vrot.lane.b32.xlu1 %v1022_v5, %s3497_s22 }
 0x7ad   :  { %v3047_v6 = vpop.f32.mrf.mxu1 }
 0x81a   :  { %v1029_v7 = vpop.permute.xlu1 %1028 }
 0x81b   :  { %v1034_v8 = vsel %vm361_vm2, %v3758_v26, %v1029_v7 }
 0x81c   :  { %3056 = vmatprep.mubr.msk.f32.mxu0 %vm186_vm0, %v1034_v8 }
 0x81e   :  { %v1031_v9 = vpop.permute.xlu1 %1030 }
 0x81f   :  { %v1035_v10 = vsel %vm361_vm2, %v3760_v28, %v1031_v9 }
 0x820   :  { %3057 = vmatmul.mubr.msk.f32.vlgmr.msra.gmra.mxu0 %vm186_vm0, %v1035_v10 }
 0x821   :  { %3071 = vmatpush3.msra.mxu0 %v1291_v53  ;;  %v2839_v53 = vld [vmem:[%s4081_s14] ss:$0 sm:$0xff] }
 0x822   :  { %3072 = vmatprep.subr.mxu0 %v1290_v54 }
 0x823   :  { %3073 = vmatpush3.msra.mxu0 %v1290_v54 }
 0x824   :  { %3074 = vmatprep.subr.mxu0 %v1289_v56 }
 0x825   :  { %3075 = vmatpush3.msra.mxu0 %v1289_v56 }
 0x826   :  { %3076 = vmatprep.subr.mxu0 %v1288_v37 }
 0x827   :  { %3077 = vmatpush3.msra.mxu0 %v1288_v37 }
 0x828   :  { %3078 = vmatprep.subr.mxu0 %v1287_v57 }
 0x829   :  { %3079 = vmatpush3.msra.mxu0 %v1287_v57 }
 0x82a   :  { %3080 = vmatprep.subr.mxu0 %v1286_v58 }
 0x82b   :  { %3081 = vmatpush3.msra.mxu0 %v1286_v58  ;;  %v2840_v58 = vld [vmem:[%s4082_s15] ss:$0 sm:$0xff] }
 0x82c   :  { %3082 = vmatprep.subr.mxu0 %v1285_v59 }
 0x82d   :  { %3083 = vmatpush3.msra.mxu0 %v1285_v59 }
 0x82e   :  { %3084 = vmatprep.subr.mxu0 %v1284_v60 }
 0x82f   :  { %3085 = vmatpush3.msra.mxu0 %v1284_v60 }
 0x830   :  { %3110 = vmatprep.subr.mxu0 %v3506_v34 }
 0x8e0   :  { %v3058_v12 = vpop.f32.mrf.mxu0 }
 0x8e1   :  { %v1125_v13 = vadd.f32 %v3058_v12, %v2828_v11 }
 0x8e2   :  { %v1119_v14 = vpop.f32.mrf.mxu0 }
 0x8e3   :  { %v1120_v15 = vadd.f32 %v2828_v11, %v1119_v14  ;;  %v1129_v16 = vadd.f32 %v1125_v13, %v3685_v33 }
 0x8e5   :  { %v1135_v17 = vsel %vm186_vm0, %v1129_v16, 0.0  ;;  %v1128_v18 = vadd.f32 %v1120_v15, %v3681_v31  ;;  %v1177_v31 = vld [vmem:[%s4077_s10 + $0x18] sm:$0xff] }
 0x8e6   :  { %1136 = vadd.xlane.f32.xlu1 %v1135_v17  ;;  %3059 = vmatprep.subr.mxu1 %v1177_v31 }
 0x8e7   :  { %v1132_v19 = vsel %vm186_vm0, %v1128_v18, 0.0  ;;  %3060 = vmatpush3.msra.mxu1 %v1177_v31 }
 0x8e8   :  { %1133 = vadd.xlane.f32.xlu0 %v1132_v19  ;;  %3061 = vmatprep.subr.mxu1 %v1176_v29 }
 0x8e9   :  { %3062 = vmatpush3.msra.mxu1 %v1176_v29 }
 0x8ea   :  { %3063 = vmatprep.subr.mxu1 %v1175_v30 }
 0x8eb   :  { %3064 = vmatpush3.msra.mxu1 %v1175_v30 }
 0x8ec   :  { %3065 = vmatprep.subr.mxu1 %v1174_v32 }
 0x8ed   :  { %3066 = vmatpush3.msra.mxu1 %v1174_v32 }
 0x96f   :  { %v1137_v20 = vpop.xlane.xlu1 %1136 }
 0x970   :  { %v1139_v21 = vmul.f32 0.03125, %v1137_v20  ;;  %v2836_v20 = vld [vmem:[%s4080_s13] ss:$0 sm:$0xff] }
 0x971   :  { %v1134_v22 = vpop.xlane.xlu0 %1133 }
 0x972   :  { %v1138_v23 = vmul.f32 0.03125, %v1134_v22  ;;  %v1141_v24 = vsub.f32 %v1129_v16, %v1139_v21 }
 0x974   :  { %v1140_v25 = vsub.f32 %v1128_v18, %v1138_v23  ;;  %v1143_v28 = vmul.f32 %v1141_v24, %v1141_v24 }
 0x976   :  { %v1142_v26 = vmul.f32 %v1140_v25, %v1140_v25  ;;  %v1147_v33 = vsel %vm186_vm0, %v1143_v28, 0.0 }
 0x978   :  { %v1144_v27 = vsel %vm186_vm0, %v1142_v26, 0.0 }
 0x979   :  { %1145 = vadd.xlane.f32.xlu0 %v1144_v27 }
 0x97d   :  { %1148 = vadd.xlane.f32.xlu0 %v1147_v33 }
 0xa02   :  { %v1146_v35 = vpop.xlane.xlu0 %1145 }
 0xa03   :  { %v1150_v36 = vmul.f32 0.03125, %v1146_v35 }
 0xa05   :  { %v1152_v38 = vadd.f32 1e-12, %v1150_v36 }
 0xa06   :  { %v1149_v40 = vpop.xlane.xlu0 %1148 }
 0xa07   :  { %3241 = vrsqrt.f32 %v1152_v38  ;;  %v1151_v41 = vmul.f32 0.03125, %v1149_v40 }
 0xa09   :  { %v1153_v42 = vadd.f32 1e-12, %v1151_v41 }
 0xa0b   :  { %3243 = vrsqrt.f32 %v1153_v42  ;;  %v2844_v42 = vld [vmem:[%s4098_s25 + $0x38] sm:$0xff] }
 0xa0c   :  { %3089 = vmatprep.subr.mxu1 %v2844_v42 }
 0xa14   :  { %v3242_v43 = vpop.eup %3241 }
 0xa15   :  { %v1156_v45 = vmul.f32 %v3242_v43, %v1140_v25  ;;  %v2843_v43 = vld [vmem:[%s4098_s25 + $0x30] sm:$0xff] }
 0xa17   :  { %v1164_v47 = vmul.f32 %v2831_v44, %v1156_v45  ;;  %v2841_v45 = vld [vmem:[%s4098_s25 + $0x20] sm:$0xff] }
 0xa18   :  { %v3244_v48 = vpop.eup %3243 }
 0xa19   :  { %v1157_v49 = vmul.f32 %v3244_v48, %v1141_v24  ;;  %v3812_v50 = vadd.f32 %v2832_v46, %v1164_v47 }
 0xa1b   :  { %v1165_v51 = vmul.f32 %v2831_v44, %v1157_v49  ;;  %3067 = vmatprep.mubr.msk.f32.mxu1 %vm186_vm0, %v3812_v50  ;;  %v2842_v44 = vld [vmem:[%s4098_s25 + $0x28] sm:$0xff] }
 0xa1d   :  { %v1173_v52 = vadd.f32 %v2832_v46, %v1165_v51 }
 0xa1f   :  { %3068 = vmatmul.mubr.msk.f32.vlgmr.msra.gmra.mxu1 %vm186_vm0, %v1173_v52 }
 0xa20   :  { %3090 = vmatpush3.msra.mxu1 %v2844_v42 }
 0xa21   :  { %3091 = vmatprep.subr.mxu1 %v2843_v43 }
 0xa22   :  { %3092 = vmatpush3.msra.mxu1 %v2843_v43 }
 0xa23   :  { %3093 = vmatprep.subr.mxu1 %v2842_v44 }
 0xa24   :  { %3094 = vmatpush3.msra.mxu1 %v2842_v44 }
 0xa25   :  { %3095 = vmatprep.subr.mxu1 %v2841_v45 }
 0xa26   :  { %3096 = vmatpush3.msra.mxu1 %v2841_v45 }
 0xa27   :  { %3100 = vmatprep.subr.mxu1 %v3506_v34 }
 0xadf   :  { %v3069_v63 = vpop.f32.mrf.mxu1 }
 0xae0   :  { %v1263_v0 = vadd.f32 %v3069_v63, %v2833_v62  ;;  %v2846_v63 = vld [vmem:[%s4072_s5 + $0x1] ss:$0 sm:$0xff] }
 0xae1   :  { %v1257_v39 = vpop.f32.mrf.mxu1 }
 0xae2   :  { %v1267_v1 = vmul.f32 %v1263_v0, %v1263_v0  ;;  %v1258_v2 = vadd.f32 %v2833_v62, %v1257_v39 }
 0xae4   :  { %v1269_v3 = vmul.f32 %v1267_v1, %v1263_v0  ;;  %v1266_v4 = vmul.f32 %v1258_v2, %v1258_v2 }
 0xae6   :  { %v1271_v5 = vmul.f32 0.044715, %v1269_v3  ;;  %v1268_v6 = vmul.f32 %v1266_v4, %v1258_v2 }
 0xae8   :  { %v1273_v7 = vadd.f32 %v1271_v5, %v1263_v0  ;;  %v1270_v8 = vmul.f32 0.044715, %v1268_v6 }
 0xaea   :  { %v1275_v9 = vmul.f32 0.7978846, %v1273_v7  ;;  %v1272_v10 = vadd.f32 %v1270_v8, %v1258_v2 }
 0xaec   :  { %3245 = vtanh.f32 %v1275_v9  ;;  %v1274_v11 = vmul.f32 0.7978846, %v1272_v10 }
 0xaee   :  { %3247 = vtanh.f32 %v1274_v11 }
 0xaf9   :  { %v3246_v12 = vpop.eup %3245 }
 0xafa   :  { %v1279_v13 = vadd.f32 1.0, %v3246_v12 }
 0xafb   :  { %v3248_v14 = vpop.eup %3247 }
 0xafc   :  { %v1278_v15 = vadd.f32 1.0, %v3248_v14  ;;  %v1281_v16 = vmul.f32 0.5, %v1279_v13 }
 0xafe   :  { %v1280_v17 = vmul.f32 0.5, %v1278_v15  ;;  %v1283_v19 = vmul.f32 %v1281_v16, %v1263_v0 }
 0xb00   :  { %v1282_v18 = vmul.f32 %v1280_v17, %v1258_v2 }
 0xb02   :  { %3086 = vmatprep.mubr.msk.f32.mxu0 %vm1299_vm4, %v1282_v18 }
 0xb03   :  { %3087 = vmatmul.mubr.msk.f32.vlgmr.msra.gmra.mxu0 %vm1299_vm4, %v1283_v19 }
 0xb04   :  { %3112 = vmatprep.mubr.msk.f32.mxu0 %vm3507_vm1, %v3506_v34 }
 0xbc3   :  { %v3088_v21 = vpop.f32.mrf.mxu0 }
 0xbc4   :  { %v1378_v22 = vadd.f32 %v3088_v21, %v2836_v20 }
 0xbc5   :  { %v1372_v23 = vpop.f32.mrf.mxu0 }
 0xbc6   :  { %v1373_v24 = vadd.f32 %v2836_v20, %v1372_v23  ;;  %v1382_v25 = vadd.f32 %v1378_v22, %v1173_v52 }
 0xbc8   :  { %v1388_v26 = vsel %vm186_vm0, %v1382_v25, 0.0  ;;  %v1381_v27 = vadd.f32 %v1373_v24, %v3812_v50 }
 0xbc9   :  { %1389 = vadd.xlane.f32.xlu1 %v1388_v26 }
 0xbca   :  { %v1385_v28 = vsel %vm186_vm0, %v1381_v27, 0.0 }
 0xbcb   :  { %1386 = vadd.xlane.f32.xlu0 %v1385_v28 }
 0xc52   :  { %v1390_v33 = vpop.xlane.xlu1 %1389 }
 0xc53   :  { %v1392_v31 = vmul.f32 0.03125, %v1390_v33 }
 0xc54   :  { %v1387_v29 = vpop.xlane.xlu0 %1386 }
 0xc55   :  { %v1394_v30 = vsub.f32 %v1382_v25, %v1392_v31  ;;  %v1391_v32 = vmul.f32 0.03125, %v1387_v29 }
 0xc57   :  { %v1393_v35 = vsub.f32 %v1381_v27, %v1391_v32  ;;  %v1396_v36 = vmul.f32 %v1394_v30, %v1394_v30 }
 0xc59   :  { %v1400_v38 = vsel %vm186_vm0, %v1396_v36, 0.0  ;;  %v1395_v40 = vmul.f32 %v1393_v35, %v1393_v35 }
 0xc5a   :  { %1401 = vadd.xlane.f32.xlu1 %v1400_v38 }
 0xc5b   :  { %v1397_v41 = vsel %vm186_vm0, %v1395_v40, 0.0 }
 0xc5c   :  { %1398 = vadd.xlane.f32.xlu0 %v1397_v41 }
 0xce3   :  { %v1402_v46 = vpop.xlane.xlu1 %1401 }
 0xce4   :  { %v1404_v47 = vmul.f32 0.03125, %v1402_v46 }
 0xce5   :  { %v1399_v48 = vpop.xlane.xlu0 %1398 }
 0xce6   :  { %v1406_v49 = vadd.f32 1e-12, %v1404_v47  ;;  %v1403_v50 = vmul.f32 0.03125, %v1399_v48 }
 0xce8   :  { %3249 = vrsqrt.f32 %v1406_v49  ;;  %v1405_v51 = vadd.f32 1e-12, %v1403_v50 }
 0xcea   :  { %3251 = vrsqrt.f32 %v1405_v51 }
 0xcf5   :  { %v3250_v52 = vpop.eup %3249 }
 0xcf6   :  { %v1410_v54 = vmul.f32 %v3250_v52, %v1394_v30 }
 0xcf7   :  { %v3252_v56 = vpop.eup %3251 }
 0xcf8   :  { %v1409_v37 = vmul.f32 %v3252_v56, %v1393_v35  ;;  %v1418_v57 = vmul.f32 %v2839_v53, %v1410_v54 }
 0xcfa   :  { %v1417_v59 = vmul.f32 %v2839_v53, %v1409_v37  ;;  %v3875_v62 = vadd.f32 %v2840_v58, %v1418_v57 }
 0xcfc   :  { %v3873_v60 = vadd.f32 %v2840_v58, %v1417_v59 }
 0xcfe   :  { %3097 = vmatprep.mubr.msk.f32.mxu1 %vm186_vm0, %v3873_v60 }
 0xcff   :  { %3098 = vmatmul.mubr.msk.f32.vlgmr.msra.gmra.mxu1 %vm186_vm0, %v3875_v62 }
 0xd00   :  { %3102 = vmatprep.mubr.msk.f32.mxu1 %vm3507_vm1, %v3506_v34 }
 0xdbf   :  { %v3099_v0 = vpop.f32.mrf.mxu1 }
 0xdc0   :  { %v3886_v39 = vadd.f32 %v3099_v0, %v2846_v63 }
 0xdc1   :  { %v1512_v1 = vpop.f32.mrf.mxu1 }
 0xdc2   :  { %v3888_v2 = vadd.f32 %v2846_v63, %v1512_v1  ;;  %1599 = vrot.lane.b32.xlu1 %v3886_v39, %s3508_s26 }
 0xdc4   :  { %1522 = vrot.lane.b32.xlu0 %v3888_v2, %s3508_s26 }
 0xe34   :  { %v1600_v4 = vpop.permute.xlu1 %1599 }
 0xe36   :  { %v1523_v3 = vpop.permute.xlu0 %1522 }
 0xe37   :  { %3101 = vmatpush3.xpose.msk.msra.mxu1 %vm361_vm2, %v1523_v3 }
 0xe38   :  { %3105 = vmatprep.subr.mxu1 %v3506_v34 }
 0xe3a   :  { %3103 = vmatmul.mubr.msk.f32.vlgmr.msra.gmra.mxu1 %vm361_vm2, %v3888_v2 }
 0xe3b   :  { %3106 = vmatpush3.xpose.msk.msra.mxu1 %vm361_vm2, %v1600_v4  ;;  %3107 = vmatprep.mubr.msk.f32.mxu1 %vm3507_vm1, %v3506_v34 }
 0xe3c   :  { %3115 = vmatprep.subr.mxu1 %v3506_v34 }
 0xe3e   :  { %3108 = vmatmul.mubr.msk.f32.vlgmr.msra.gmra.mxu1 %vm361_vm2, %v3886_v39 }
 0xe3f   :  { %3117 = vmatprep.mubr.msk.f32.mxu1 %vm3507_vm1, %v3506_v34 }
 0xefa   :  { %v1594_v5 = vpop.f32.mrf.mxu1 }
 0xefb   :  { %v1675_v6 = vmul.f32 0.25, %v1594_v5 }
 0xefc   :  { %v3104_v7 = vpop.f32.mrf.mxu1 }
 0xefd   :  { %v1677_v8 = vadd.f32 %v1675_v6, %v3718_v55 }
 0xefe   :  { %v1671_v9 = vpop.f32.mrf.mxu1 }
 0xeff   :  { %v1676_v10 = vmul.f32 0.25, %v1671_v9  ;;  %v1679_v11 = vsel %vm517_vm3, %v1677_v8, -inf  ;;  %v2862_v9 = vld [vmem:[%s4073_s6 + $0x28] sm:$0xff] }
 0xf00   :  { %1680 = vmax.xlane.f32.xlu1 %v1679_v11  ;;  %v3109_v12 = vpop.f32.mrf.mxu1 }
 0xf01   :  { %v1678_v13 = vadd.f32 %v1676_v10, %v3721_v61  ;;  %v2861_v10 = vld [vmem:[%s4073_s6 + $0x20] sm:$0xff] }
 0xf03   :  { %v1682_v14 = vsel %vm517_vm3, %v1678_v13, -inf }
 0xf04   :  { %1683 = vmax.xlane.f32.xlu0 %v1682_v14 }
 0xf11   :  { %1777 = vrot.lane.b32.xlu1 %v3886_v39, %s3510_s27 }
 0xf15   :  { %1855 = vrot.lane.b32.xlu1 %v3888_v2, %s3511_s28 }
 0xf19   :  { %1933 = vrot.lane.b32.xlu1 %v3886_v39, %s3511_s28 }
 0xf89   :  { %v1681_v15 = vpop.xlane.xlu1 %1680 }
 0xf8a   :  { %v1685_v16 = vsub.f32 %v1677_v8, %v1681_v15  ;;  %v2864_v8 = vld [vmem:[%s4073_s6 + $0x38] sm:$0xff] }
 0xf8c   :  { %v1687_v17 = vmul.f32 1.442695, %v1685_v16 }
 0xf8d   :  { %v1778_v18 = vpop.permute.xlu1 %1777  ;;  %v1684_v19 = vpop.xlane.xlu0 %1683 }
 0xf8e   :  { %3253 = vpow2.f32 %v1687_v17  ;;  %v1686_v20 = vsub.f32 %v1678_v13, %v1684_v19  ;;  %3116 = vmatpush3.msra.mxu1 %v1778_v18  ;;  %v2865_v19 = vld [vmem:[#allocation10 + $0x1] ss:$0 sm:$0xff] }
 0xf8f   :  { %3125 = vmatprep.subr.mxu1 %v3506_v34 }
 0xf90   :  { %v1689_v21 = vmul.f32 1.442695, %v1686_v20 }
 0xf91   :  { %v1856_v26 = vpop.permute.xlu1 %1855 }
 0xf92   :  { %3255 = vpow2.f32 %v1689_v21 }
 0xf95   :  { %v1934_v27 = vpop.permute.xlu1 %1933 }
 0xf9b   :  { %v3254_v22 = vpop.eup %3253 }
 0xf9c   :  { %v1691_v23 = vsel %vm517_vm3, %v3254_v22, 0.0 }
 0xf9d   :  { %1692 = vadd.xlane.f32.xlu0 %v1691_v23 }
 0xf9f   :  { %v3256_v24 = vpop.eup %3255 }
 0xfa0   :  { %v1694_v25 = vsel %vm517_vm3, %v3256_v24, 0.0 }
 0xfa1   :  { %1695 = vadd.xlane.f32.xlu1 %v1694_v25 }
 0xfb2   :  { %1931 = vrot.lane.b32.xlu1 %v3886_v39, %s3512_s7 }
 0xfb3   :  { %1701 = vrot.lane.b32.xlu0 %v3888_v2, %s3510_s27 }
 0xfb7   :  { %1853 = vrot.lane.b32.xlu0 %v3888_v2, %s3512_s7 }
0x1026   :  { %v1693_v28 = vpop.xlane.xlu0 %1692 }
0x1027   :  { %3257 = vrcp.f32 %v1693_v28 }
0x102a   :  { %v1696_v33 = vpop.xlane.xlu1 %1695  ;;  %v1702_v31 = vpop.permute.xlu0 %1701 }
0x102b   :  { %3259 = vrcp.f32 %v1696_v33  ;;  %3111 = vmatpush3.msra.mxu0 %v1702_v31 }
0x102c   :  { %3120 = vmatprep.subr.mxu0 %v3506_v34 }
0x102e   :  { %v1854_v36 = vpop.permute.xlu0 %1853  ;;  %v1932_v38 = vpop.permute.xlu1 %1931 }
0x1034   :  { %v3258_v29 = vpop.eup %3257 }
0x1035   :  { %v1698_v30 = vmul.f32 %v3258_v29, %v3254_v22 }
0x1037   :  { %3113 = vmatmul.mubr.msk.f32.vlgmr.msra.gmra.mxu0 %vm517_vm3, %v1698_v30 }
0x1038   :  { %v3260_v32 = vpop.eup %3259  ;;  %3121 = vmatpush3.xpose.msk.msra.mxu0 %vm361_vm2, %v1856_v26  ;;  %3122 = vmatprep.mubr.msk.f32.mxu0 %vm3507_vm1, %v3506_v34 }
0x1039   :  { %v1700_v35 = vmul.f32 %v3260_v32, %v3256_v24  ;;  %3130 = vmatprep.subr.mxu0 %v3506_v34 }
0x103b   :  { %3118 = vmatmul.mubr.msk.f32.vlgmr.msra.gmra.mxu1 %vm517_vm3, %v1700_v35  ;;  %3123 = vmatmul.mubr.msk.f32.vlgmr.msra.gmra.mxu0 %vm361_vm2, %v1854_v36 }
0x103c   :  { %3126 = vmatpush3.xpose.msk.msra.mxu1 %vm361_vm2, %v1934_v27  ;;  %3127 = vmatprep.mubr.msk.f32.mxu1 %vm3507_vm1, %v3506_v34 }
0x103d   :  { %3135 = vmatprep.subr.mxu1 %v3506_v34  ;;  %3132 = vmatprep.mubr.msk.f32.mxu0 %vm3507_vm1, %v3506_v34 }
0x103f   :  { %3128 = vmatmul.mubr.msk.f32.vlgmr.msra.gmra.mxu1 %vm361_vm2, %v1932_v38 }
0x1040   :  { %3137 = vmatprep.mubr.msk.f32.mxu1 %vm3507_vm1, %v3506_v34 }
0x10f7   :  { %v3942_v40 = vpop.f32.mrf.mxu0 }
0x10f9   :  { %v3114_v41 = vpop.f32.mrf.mxu0 }
0x10fa   :  { %v2871_v41 = vld [vmem:[%s4077_s10 + $0x28] sm:$0xff] }
0x10fb   :  { %v3944_v42 = vpop.f32.mrf.mxu1  ;;  %v1927_v43 = vpop.f32.mrf.mxu0 }
0x10fc   :  { %v2009_v44 = vmul.f32 0.25, %v1927_v43 }
0x10fd   :  { %v3119_v45 = vpop.f32.mrf.mxu1  ;;  %v3124_v46 = vpop.f32.mrf.mxu0 }
0x10fe   :  { %v2011_v47 = vadd.f32 %v2009_v44, %v3718_v55 }
0x10ff   :  { %v2005_v48 = vpop.f32.mrf.mxu1 }
0x1100   :  { %v2010_v49 = vmul.f32 0.25, %v2005_v48  ;;  %v2013_v50 = vsel %vm517_vm3, %v2011_v47, -inf }
0x1101   :  { %2014 = vmax.xlane.f32.xlu0 %v2013_v50  ;;  %v3129_v51 = vpop.f32.mrf.mxu1  ;;  %v2868_v50 = vld [vmem:[#allocation11 + $0x1] ss:$0 sm:$0xff] }
0x1102   :  { %v2012_v52 = vadd.f32 %v2010_v49, %v3721_v61 }
0x1104   :  { %v2016_v34 = vsel %vm517_vm3, %v2012_v52, -inf }
0x1105   :  { %2017 = vmax.xlane.f32.xlu1 %v2016_v34 }
0x1116   :  { %2111 = vrot.lane.b32.xlu1 %v3886_v39, %s3513_s24 }
0x118a   :  { %v2015_v53 = vpop.xlane.xlu0 %2014 }
0x118b   :  { %v2019_v54 = vsub.f32 %v2011_v47, %v2015_v53 }
0x118d   :  { %v2021_v56 = vmul.f32 1.442695, %v2019_v54 }
0x118e   :  { %v2018_v37 = vpop.xlane.xlu1 %2017 }
0x118f   :  { %3261 = vpow2.f32 %v2021_v56  ;;  %v2020_v55 = vsub.f32 %v2012_v52, %v2018_v37  ;;  %v2869_v52 = vld [vmem:[#allocation13 + $0x1] ss:$0 sm:$0xff] }
0x1191   :  { %v2023_v57 = vmul.f32 1.442695, %v2020_v55 }
0x1192   :  { %v2112_v58 = vpop.permute.xlu1 %2111 }
0x1193   :  { %3263 = vpow2.f32 %v2023_v57  ;;  %3136 = vmatpush3.msra.mxu1 %v2112_v58  ;;  %v2884_v57 = vld [vmem:[%s4079_s12 + $0x78] sm:$0xff]  ;;  %v2883_v58 = vld [vmem:[%s4079_s12 + $0x70] sm:$0xff] }
0x119c   :  { %v3262_v59 = vpop.eup %3261 }
0x119d   :  { %v2025_v63 = vsel %vm517_vm3, %v3262_v59, 0.0 }
0x119e   :  { %2026 = vadd.xlane.f32.xlu0 %v2025_v63  ;;  %v2881_v63 = vld [vmem:[%s4079_s12 + $0x60] sm:$0xff] }
0x11a0   :  { %v3264_v61 = vpop.eup %3263 }
0x11a1   :  { %v2028_v0 = vsel %vm517_vm3, %v3264_v61, 0.0 }
0x11a2   :  { %2029 = vadd.xlane.f32.xlu0 %v2028_v0  ;;  %v2879_v0 = vld [vmem:[%s4079_s12 + $0x50] sm:$0xff] }
0x11b8   :  { %2035 = vrot.lane.b32.xlu0 %v3888_v2, %s3513_s24  ;;  %v2863_v2 = vld [vmem:[%s4073_s6 + $0x30] sm:$0xff] }
0x1227   :  { %v2027_v39 = vpop.xlane.xlu0 %2026 }
0x1228   :  { %3265 = vrcp.f32 %v2027_v39  ;;  %v2878_v39 = vld [vmem:[%s4079_s12 + $0x48] sm:$0xff] }
0x122b   :  { %v2030_v1 = vpop.xlane.xlu0 %2029 }
0x122c   :  { %3267 = vrcp.f32 %v2030_v1  ;;  %v2877_v1 = vld [vmem:[%s4079_s12 + $0x40] sm:$0xff] }
0x122f   :  { %v2036_v3 = vpop.permute.xlu0 %2035 }
0x1230   :  { %3131 = vmatpush3.msra.mxu0 %v2036_v3  ;;  %v2874_v3 = vld [vmem:[#allocation14 + $0x1] ss:$0 sm:$0xff] }
0x1231   :  { %3140 = vmatprep.subr.mxu0 %v2864_v8 }
0x1235   :  { %v3266_v4 = vpop.eup %3265 }
0x1236   :  { %v2032_v5 = vmul.f32 %v3266_v4, %v3262_v59  ;;  %v2882_v59 = vld [vmem:[%s4079_s12 + $0x68] sm:$0xff] }
0x1238   :  { %3133 = vmatmul.mubr.msk.f32.vlgmr.msra.gmra.mxu0 %vm517_vm3, %v2032_v5 }
0x1239   :  { %v3268_v6 = vpop.eup %3267  ;;  %3141 = vmatpush3.msra.mxu0 %v2864_v8 }
0x123a   :  { %v2034_v7 = vmul.f32 %v3268_v6, %v3264_v61  ;;  %3142 = vmatprep.subr.mxu0 %v2863_v2  ;;  %v2880_v61 = vld [vmem:[%s4079_s12 + $0x58] sm:$0xff] }
0x123b   :  { %3143 = vmatpush3.msra.mxu0 %v2863_v2 }
0x123c   :  { %3138 = vmatmul.mubr.msk.f32.vlgmr.msra.gmra.mxu1 %vm517_vm3, %v2034_v7  ;;  %3144 = vmatprep.subr.mxu0 %v2862_v9 }
0x123d   :  { %3145 = vmatpush3.msra.mxu0 %v2862_v9 }
0x123e   :  { %3146 = vmatprep.subr.mxu0 %v2861_v10 }
0x123f   :  { %3147 = vmatpush3.msra.mxu0 %v2861_v10 }
0x1240   :  { %3162 = vmatprep.subr.mxu0 %v2884_v57 }
0x12f8   :  { %v2107_v11 = vpop.f32.mrf.mxu0 }
0x12f9   :  { %2189 = vrot.lane.b32.xlu1 %v2107_v11, %s3497_s22 }
0x12fa   :  { %v3134_v12 = vpop.f32.mrf.mxu0 }
0x12fc   :  { %v2183_v13 = vpop.f32.mrf.mxu1 }
0x12fd   :  { %2191 = vrot.lane.b32.xlu1 %v2183_v13, %s3497_s22 }
0x12fe   :  { %v3139_v14 = vpop.f32.mrf.mxu1 }
0x136b   :  { %v2190_v15 = vpop.permute.xlu1 %2189 }
0x136c   :  { %v2195_v16 = vsel %vm361_vm2, %v3942_v40, %v2190_v15  ;;  %v2872_v40 = vld [vmem:[%s4077_s10 + $0x30] sm:$0xff] }
0x136d   :  { %3148 = vmatprep.mubr.msk.f32.mxu0 %vm186_vm0, %v2195_v16 }
0x136f   :  { %v2192_v17 = vpop.permute.xlu1 %2191 }
0x1370   :  { %v2196_v18 = vsel %vm361_vm2, %v3944_v42, %v2192_v17  ;;  %v2870_v42 = vld [vmem:[%s4077_s10 + $0x20] sm:$0xff] }
0x1371   :  { %3149 = vmatmul.mubr.msk.f32.vlgmr.msra.gmra.mxu0 %vm186_vm0, %v2196_v18 }
0x1372   :  { %3163 = vmatpush3.msra.mxu0 %v2884_v57 }
0x1373   :  { %3164 = vmatprep.subr.mxu0 %v2883_v58 }
0x1374   :  { %3165 = vmatpush3.msra.mxu0 %v2883_v58 }
0x1375   :  { %3166 = vmatprep.subr.mxu0 %v2882_v59 }
0x1376   :  { %3167 = vmatpush3.msra.mxu0 %v2882_v59  ;;  %v2892_v59 = vld [vmem:[%s4082_s15 + $0x1] ss:$0 sm:$0xff] }
0x1377   :  { %3168 = vmatprep.subr.mxu0 %v2881_v63 }
0x1378   :  { %3169 = vmatpush3.msra.mxu0 %v2881_v63 }
0x1379   :  { %3170 = vmatprep.subr.mxu0 %v2880_v61 }
0x137a   :  { %3171 = vmatpush3.msra.mxu0 %v2880_v61 }
0x137b   :  { %3172 = vmatprep.subr.mxu0 %v2879_v0 }
0x137c   :  { %3173 = vmatpush3.msra.mxu0 %v2879_v0 }
0x137d   :  { %3174 = vmatprep.subr.mxu0 %v2878_v39 }
0x137e   :  { %3175 = vmatpush3.msra.mxu0 %v2878_v39  ;;  %v2692_v39 = vld [vmem:[%s4085_s18 + $0x8] sm:$0xff] }
0x137f   :  { %3176 = vmatprep.subr.mxu0 %v2877_v1 }
0x1380   :  { %3177 = vmatpush3.msra.mxu0 %v2877_v1  ;;  %v2691_v1 = vld [vmem:[%s4085_s18] sm:$0xff] }
0x1431   :  { %v3150_v20 = vpop.f32.mrf.mxu0 }
0x1432   :  { %v2288_v21 = vadd.f32 %v3150_v20, %v2865_v19 }
0x1433   :  { %v2282_v22 = vpop.f32.mrf.mxu0 }
0x1434   :  { %v2283_v23 = vadd.f32 %v2865_v19, %v2282_v22  ;;  %v2292_v24 = vadd.f32 %v2288_v21, %v3875_v62 }
0x1436   :  { %v2300_v25 = vsel %vm186_vm0, %v2292_v24, 0.0  ;;  %v2291_v26 = vadd.f32 %v2283_v23, %v3873_v60  ;;  %v2873_v60 = vld [vmem:[%s4077_s10 + $0x38] sm:$0xff] }
0x1437   :  { %2301 = vadd.xlane.f32.xlu1 %v2300_v25  ;;  %3151 = vmatprep.subr.mxu1 %v2873_v60  ;;  %v2886_v25 = vld [vmem:[%s4080_s13 + $0x1] ss:$0 sm:$0xff] }
0x1438   :  { %v2297_v27 = vsel %vm186_vm0, %v2291_v26, 0.0  ;;  %3152 = vmatpush3.msra.mxu1 %v2873_v60 }
0x1439   :  { %2298 = vadd.xlane.f32.xlu0 %v2297_v27  ;;  %3153 = vmatprep.subr.mxu1 %v2872_v40 }
0x143a   :  { %3154 = vmatpush3.msra.mxu1 %v2872_v40 }
0x143b   :  { %3155 = vmatprep.subr.mxu1 %v2871_v41 }
0x143c   :  { %3156 = vmatpush3.msra.mxu1 %v2871_v41 }
0x143d   :  { %3157 = vmatprep.subr.mxu1 %v2870_v42 }
0x143e   :  { %3158 = vmatpush3.msra.mxu1 %v2870_v42 }
0x14c0   :  { %v2302_v28 = vpop.xlane.xlu1 %2301 }
0x14c1   :  { %v2304_v33 = vmul.f32 0.03125, %v2302_v28 }
0x14c2   :  { %v2299_v31 = vpop.xlane.xlu0 %2298 }
0x14c3   :  { %v2303_v29 = vmul.f32 0.03125, %v2299_v31  ;;  %v2306_v30 = vsub.f32 %v2292_v24, %v2304_v33 }
0x14c5   :  { %v2305_v32 = vsub.f32 %v2291_v26, %v2303_v29  ;;  %v2308_v38 = vmul.f32 %v2306_v30, %v2306_v30 }
0x14c7   :  { %v2307_v35 = vmul.f32 %v2305_v32, %v2305_v32  ;;  %v2312_v62 = vsel %vm186_vm0, %v2308_v38, 0.0 }
0x14c9   :  { %v2309_v36 = vsel %vm186_vm0, %v2307_v35, 0.0 }
0x14ca   :  { %2310 = vadd.xlane.f32.xlu0 %v2309_v36 }
0x14ce   :  { %2313 = vadd.xlane.f32.xlu0 %v2312_v62 }
0x1553   :  { %v2311_v43 = vpop.xlane.xlu0 %2310 }
0x1554   :  { %v2315_v44 = vmul.f32 0.03125, %v2311_v43 }
0x1556   :  { %v2317_v45 = vadd.f32 1e-12, %v2315_v44 }
0x1557   :  { %v2314_v46 = vpop.xlane.xlu0 %2313 }
0x1558   :  { %3269 = vrsqrt.f32 %v2317_v45  ;;  %v2316_v47 = vmul.f32 0.03125, %v2314_v46  ;;  %v2600_v45 = vld [vmem:[#allocation16 + $0x18] sm:$0xff]  ;;  %v2599_v46 = vld [vmem:[#allocation16 + $0x10] sm:$0xff] }
0x1559   :  { %3181 = vmatprep.subr.mxu1 %v2600_v45 }
0x155a   :  { %v2318_v48 = vadd.f32 1e-12, %v2316_v47  ;;  %v2598_v47 = vld [vmem:[#allocation16 + $0x8] sm:$0xff] }
0x155c   :  { %3271 = vrsqrt.f32 %v2318_v48  ;;  %v2597_v48 = vld [vmem:[#allocation16] sm:$0xff] }
0x1565   :  { %v3270_v49 = vpop.eup %3269 }
0x1566   :  { %v2321_v51 = vmul.f32 %v3270_v49, %v2305_v32 }
0x1568   :  { %v2329_v34 = vmul.f32 %v2868_v50, %v2321_v51 }
0x1569   :  { %v3272_v53 = vpop.eup %3271 }
0x156a   :  { %v2322_v54 = vmul.f32 %v3272_v53, %v2306_v30  ;;  %v3996_v56 = vadd.f32 %v2869_v52, %v2329_v34 }
0x156c   :  { %v2330_v37 = vmul.f32 %v2868_v50, %v2322_v54  ;;  %3159 = vmatprep.mubr.msk.f32.mxu1 %vm186_vm0, %v3996_v56 }
0x156e   :  { %v2338_v55 = vadd.f32 %v2869_v52, %v2330_v37 }
0x1570   :  { %3160 = vmatmul.mubr.msk.f32.vlgmr.msra.gmra.mxu1 %vm186_vm0, %v2338_v55 }
0x1571   :  { %3182 = vmatpush3.msra.mxu1 %v2600_v45 }
0x1572   :  { %3183 = vmatprep.subr.mxu1 %v2599_v46 }
0x1573   :  { %3184 = vmatpush3.msra.mxu1 %v2599_v46 }
0x1574   :  { %3185 = vmatprep.subr.mxu1 %v2598_v47 }
0x1575   :  { %3186 = vmatpush3.msra.mxu1 %v2598_v47 }
0x1576   :  { %3187 = vmatprep.subr.mxu1 %v2597_v48 }
0x1577   :  { %3188 = vmatpush3.msra.mxu1 %v2597_v48 }
0x1578   :  { %3192 = vmatprep.subr.mxu1 %v2692_v39 }
0x1630   :  { %v3161_v4 = vpop.f32.mrf.mxu1 }
0x1631   :  { %v2430_v5 = vadd.f32 %v3161_v4, %v2874_v3 }
0x1632   :  { %v2424_v6 = vpop.f32.mrf.mxu1 }
0x1633   :  { %v2434_v7 = vmul.f32 %v2430_v5, %v2430_v5  ;;  %v2425_v8 = vadd.f32 %v2874_v3, %v2424_v6  ;;  %v2893_v3 = vld [vmem:[%s4084_s17] ss:$0 sm:$0xff]  ;;  %s3514_s17 = smov [#allocation17]  }
0x1634   :  { %s2794_s27 = sshll.u32 %s3514_s17, 4  ;;  %s2795_s27 = int_to_ptr.vmem [resolvable:$true] %s2794_s27 }
0x1635   :  { %v2436_v2 = vmul.f32 %v2434_v7, %v2430_v5  ;;  %v2433_v9 = vmul.f32 %v2425_v8, %v2425_v8  ;;  %p3466_p4 = scmp.lt.s32.totalorder %s2795_s27, %s2795_s27 }
0x1637   :  { %v2438_v10 = vmul.f32 0.044715, %v2436_v2  ;;  %v2435_v11 = vmul.f32 %v2433_v9, %v2425_v8 }
0x1639   :  { %v2440_v12 = vadd.f32 %v2438_v10, %v2430_v5  ;;  %v2437_v13 = vmul.f32 0.044715, %v2435_v11  ;;  %v2896_v11 = vld [vmem:[%s4086_s19] ss:$0 sm:$0xff] }
0x163b   :  { %v2442_v14 = vmul.f32 0.7978846, %v2440_v12  ;;  %v2439_v15 = vadd.f32 %v2437_v13, %v2425_v8 }
0x163d   :  { %3273 = vtanh.f32 %v2442_v14  ;;  %v2441_v16 = vmul.f32 0.7978846, %v2439_v15 }
0x163f   :  { %3275 = vtanh.f32 %v2441_v16 }
0x164a   :  { %v3274_v17 = vpop.eup %3273 }
0x164b   :  { %v2446_v18 = vadd.f32 1.0, %v3274_v17 }
0x164c   :  { %v3276_v19 = vpop.eup %3275 }
0x164d   :  { %v2445_v20 = vadd.f32 1.0, %v3276_v19  ;;  %v2448_v21 = vmul.f32 0.5, %v2446_v18 }
0x164f   :  { %v2447_v22 = vmul.f32 0.5, %v2445_v20  ;;  %v2450_v24 = vmul.f32 %v2448_v21, %v2430_v5 }
0x1651   :  { %v2449_v23 = vmul.f32 %v2447_v22, %v2425_v8 }
0x1653   :  { %3178 = vmatprep.mubr.msk.f32.mxu0 %vm1299_vm4, %v2449_v23 }
0x1654   :  { %3179 = vmatmul.mubr.msk.f32.vlgmr.msra.gmra.mxu0 %vm1299_vm4, %v2450_v24 }
0x1714   :  { %v3180_v26 = vpop.f32.mrf.mxu0 }
0x1715   :  { %v2546_v27 = vadd.f32 %v3180_v26, %v2886_v25 }
0x1716   :  { %v2540_v28 = vpop.f32.mrf.mxu0 }
0x1717   :  { %v2541_v33 = vadd.f32 %v2886_v25, %v2540_v28  ;;  %v2550_v31 = vadd.f32 %v2546_v27, %v2338_v55 }
0x1719   :  { %v2558_v29 = vsel %vm186_vm0, %v2550_v31, 0.0  ;;  %v2549_v30 = vadd.f32 %v2541_v33, %v3996_v56  ;;  %v2891_v56 = vld [vmem:[%s4081_s14 + $0x1] ss:$0 sm:$0xff] }
0x171a   :  { %2559 = vadd.xlane.f32.xlu1 %v2558_v29 }
0x171b   :  { %v2555_v32 = vsel %vm186_vm0, %v2549_v30, 0.0 }
0x171c   :  { %2556 = vadd.xlane.f32.xlu0 %v2555_v32 }
0x17a3   :  { %v2560_v35 = vpop.xlane.xlu1 %2559 }
0x17a4   :  { %v2562_v36 = vmul.f32 0.03125, %v2560_v35 }
0x17a5   :  { %v2557_v38 = vpop.xlane.xlu0 %2556 }
0x17a6   :  { %v2564_v62 = vsub.f32 %v2550_v31, %v2562_v36  ;;  %v2561_v60 = vmul.f32 0.03125, %v2557_v38 }
0x17a8   :  { %v2563_v40 = vsub.f32 %v2549_v30, %v2561_v60  ;;  %v2566_v41 = vmul.f32 %v2564_v62, %v2564_v62 }
0x17aa   :  { %v2570_v42 = vsel %vm186_vm0, %v2566_v41, 0.0  ;;  %v2565_v43 = vmul.f32 %v2563_v40, %v2563_v40 }
0x17ab   :  { %2571 = vadd.xlane.f32.xlu1 %v2570_v42 }
0x17ac   :  { %v2567_v44 = vsel %vm186_vm0, %v2565_v43, 0.0 }
0x17ad   :  { %2568 = vadd.xlane.f32.xlu0 %v2567_v44 }
0x1834   :  { %v2572_v49 = vpop.xlane.xlu1 %2571 }
0x1835   :  { %v2574_v50 = vmul.f32 0.03125, %v2572_v49 }
0x1836   :  { %v2569_v51 = vpop.xlane.xlu0 %2568 }
0x1837   :  { %v2576_v52 = vadd.f32 1e-12, %v2574_v50  ;;  %v2573_v34 = vmul.f32 0.03125, %v2569_v51 }
0x1839   :  { %3277 = vrsqrt.f32 %v2576_v52  ;;  %v2575_v53 = vadd.f32 1e-12, %v2573_v34 }
0x183b   :  { %3279 = vrsqrt.f32 %v2575_v53 }
0x1846   :  { %v3278_v54 = vpop.eup %3277 }
0x1847   :  { %v2580_v37 = vmul.f32 %v3278_v54, %v2564_v62 }
0x1848   :  { %v3280_v55 = vpop.eup %3279 }
0x1849   :  { %v2579_v57 = vmul.f32 %v3280_v55, %v2563_v40  ;;  %v2588_v58 = vmul.f32 %v2891_v56, %v2580_v37 }
0x184b   :  { %v2587_v63 = vmul.f32 %v2891_v56, %v2579_v57  ;;  %v2596_v0 = vadd.f32 %v2892_v59, %v2588_v58 }
0x184d   :  { %v2595_v61 = vadd.f32 %v2892_v59, %v2587_v63 }
0x184f   :  { %3189 = vmatprep.mubr.msk.f32.mxu1 %vm186_vm0, %v2595_v61 }
0x1850   :  { %3190 = vmatmul.mubr.msk.f32.vlgmr.msra.gmra.mxu1 %vm186_vm0, %v2596_v0 }
0x1851   :  { %3193 = vmatpush3.msra.mxu1 %v2692_v39 }
0x1852   :  { %3194 = vmatprep.subr.mxu1 %v2691_v1 }
0x1853   :  { %3195 = vmatpush3.msra.mxu1 %v2691_v1 }
0x1910   :  { %v3191_v4 = vpop.f32.mrf.mxu1 }
0x1911   :  { %v2686_v5 = vadd.f32 %v3191_v4, %v2893_v3 }
0x1912   :  { %v2680_v6 = vpop.f32.mrf.mxu1 }
0x1913   :  { %v2690_v7 = vmax.f32 %v2686_v5, 0.0  ;;  %v2681_v8 = vadd.f32 %v2893_v3, %v2680_v6 }
0x1915   :  { %v2689_v2 = vmax.f32 %v2681_v8, 0.0  ;;  %2704 = vrot.lane.b32.xlu1 %v2690_v7, %s3508_s26 }
0x1917   :  { %2702 = vrot.lane.b32.xlu0 %v2689_v2, %s3508_s26  ;;  %s3461_s26 = scalar_lea.vmem %s2795_s27, 256 }
0x1918   :  { %p3462_p3 = scmp.ne.s32.totalorder %s2795_s27, %s3461_s26  ;;  %p3467_p5 = scmp.lt.s32.totalorder %s3461_s26, %s3461_s26 }
0x191a   :  { %p3468_p6 = por %p3467_p5, %p3466_p4 }
0x191c   :  { %p3469_p7 = pnand %p3468_p6, %p3462_p3 }
0x1987   :  { %v2705_v10 = vpop.permute.xlu1 %2704 }
0x1989   :  { %v2703_v9 = vpop.permute.xlu0 %2702 }
0x198a   :  { %3196 = vmatprep.mubr.msk.f32.mxu1 %vm361_vm2, %v2703_v9 }
0x198b   :  { %3197 = vmatmul.mubr.msk.f32.vlgmr.msra.gmra.mxu1 %vm361_vm2, %v2705_v10 }
0x1a4b   :  { %v3198_v12 = vpop.f32.mrf.mxu1 }
0x1a4c   :  { %v2782_v13 = vadd.f32 %v3198_v12, %v2896_v11 }
0x1a4d   :  { %v2776_v14 = vpop.f32.mrf.mxu1 }
0x1a4e   :  { %v2786_v15 = vadd.f32 %v2782_v13, %v2686_v5  ;;  %v2777_v16 = vadd.f32 %v2896_v11, %v2776_v14 }
0x1a50   :  { %2788 = vst.msk [vmem:[#allocation17 + $0x8] sm:$0xff] %vm186_vm0, %v2786_v15  ;;  %v2785_v17 = vadd.f32 %v2777_v16, %v2681_v8 }
0x1a52   :  { %2787 = vst.msk [vmem:[#allocation17] sm:$0xff] %vm186_vm0, %v2785_v17 }
0x1a53   :  { %3472 = shalt.err (!%p3469_p7)
}
0x1a54   :  { %2800 = dma.vmem_to_hbm [thread:$0]  %s2795_s27, 256, %s4087_s20, [#allocation4], %s3500_s8, %s3500_s8, %s3501_s0  }
0x1a55   :  { %3491 = dma.done.wait [#allocation4], 256  }
0x1a56   :  { %3492 = vsyncadd [#allocation4], 4294967040 }
0x1a57   :  { %2804 = vsyncpa [#allocation3], 1 }
0x1a58   :  { %2805 = vsyncpa [#allocation6], 1 }
0x1a59   :  { %2806 = vsyncpa [#allocation9], 1 }
0x1a5a   :  { %2807 = vsyncpa [#allocation12], 1 }
0x1a5b   :  { %2808 = vsyncpa [#allocation15], 1 }
0x1a5c   :  { %2809 = vsyncpa [#allocation4], 1 }

</bundles_post_ra>
